<compile_context>
chip_gen: v5e
topology: v5e:2x2
jax: 0.10.0
libtpu: 0.0.40
codegen_flags: <defaults>
</compile_context>

<pallas_src>
import functools
import math

import jax
import jax.numpy as jnp
from jax import lax
from jax.experimental import pallas as pl
from jax.experimental.pallas import tpu as pltpu


# ----------------------------- fused Pallas kernel -------------------------------


def _fused_forward_kernel(
    # resident inputs
    x_ref, init_w_ref, init_b_ref,
    # per-layer stacked inputs (one layer per grid step)
    wqkv_ref, wo_ref, bn1_g_ref, bn1_b_ref,
    ff_w1_ref, ff_b1_ref, ff_w2_ref, ff_b2_ref, bn2_g_ref, bn2_b_ref,
    # decoder weights + constant masks (resident)
    w_np_ref, w_fc_ref, w_place_ref, w_step_ref, w_po_ref,
    hmask_ref, rowmask_ref,
    # outputs
    emb_ref, gemb_ref, logp_ref,
    # scratch
    h_sc,
    *, n_heads, tanh_clipping):
    f32 = jnp.float32
    bf16 = jnp.bfloat16

    B, N, node_dim = x_ref.shape
    D = init_w_ref.shape[1]
    H = n_heads
    dk = D // H
    BN = B * N

    l = pl.program_id(0)
    n_layers = pl.num_programs(0)

    inv_sqrt_dk = 1.0 / math.sqrt(dk)
    inv_sqrt_d = 1.0 / math.sqrt(D)

    hm = hmask_ref[...]        # (H, D)   0/1: lanes of head h
    rm = rowmask_ref[...]      # (H*N, D) 0/1: row h*N+i keeps lanes of head h

    def softmax_last(s):
        # exact normalization (approx reciprocal dropped for parity)
        m = jnp.max(s, axis=-1, keepdims=True)
        e = jnp.exp(s - m)
        return e / jnp.sum(e, axis=-1, keepdims=True)

    def batchnorm(h, gamma, beta):
        # BatchNorm1d, training mode, single-pass batch stats over the B*N rows.
        s1 = jnp.sum(h, axis=0, keepdims=True)
        s2 = jnp.sum(h * h, axis=0, keepdims=True)
        mean = s1 * (1.0 / BN)
        var = jnp.maximum(s2 * (1.0 / BN) - mean * mean, 0.0)
        return (h - mean) * lax.rsqrt(var + 1e-5) * gamma + beta

    # ---- _init_embed (first grid step only) ----
    @pl.when(l == 0)
    def _():
        x2d = x_ref[...].reshape(BN, node_dim).astype(bf16)
        h_sc[...] = (jnp.dot(x2d, init_w_ref[...], preferred_element_type=f32)
                     + init_b_ref[...])

    h = h_sc[...]                                                     # (BN, D) f32

    # ---- one encoder layer per grid step ----
    # fused Q/K/V projection: single (BN, D) @ (D, 3D) MXU matmul
    qkv = jnp.dot(h.astype(bf16), wqkv_ref[0], preferred_element_type=f32)
    q3 = qkv[:, 0:D].reshape(B, N, D)
    k3 = qkv[:, D:2 * D].reshape(B, N, D).astype(bf16)
    v3 = qkv[:, 2 * D:3 * D].reshape(B, N, D).astype(bf16)

    # per-head scores as one batched MXU contraction over D: rows of q_rep are
    # (head, query) pairs with the lanes of the other heads zeroed, so the full-D
    # contraction equals the per-head dk contraction.
    q_rep = (q3[:, None, :, :] * hm[None, :, None, :]).reshape(B, H * N, D)
    compat = jnp.einsum('bmd,bkd->bmk', q_rep.astype(bf16), k3,
                        preferred_element_type=f32) * inv_sqrt_dk     # (B, H*N, N)
    attn = softmax_last(compat)

    # head combine: batched MXU contraction over the N keys, then head-select + fold
    ho = jnp.einsum('bmj,bjd->bmd', attn.astype(bf16), v3,
                    preferred_element_type=f32)                       # (B, H*N, D)
    heads = jnp.sum((ho * rm[None, :, :]).reshape(B, H, N, D), axis=1)  # (B, N, D)

    h = h + jnp.dot(heads.reshape(BN, D).astype(bf16), wo_ref[0],
                    preferred_element_type=f32)
    h = batchnorm(h, bn1_g_ref[0], bn1_b_ref[0])

    hid = jnp.maximum(
        jnp.dot(h.astype(bf16), ff_w1_ref[0], preferred_element_type=f32)
        + ff_b1_ref[0], 0.0)
    h = h + jnp.dot(hid.astype(bf16), ff_w2_ref[0],
                    preferred_element_type=f32) + ff_b2_ref[0]
    h = batchnorm(h, bn2_g_ref[0], bn2_b_ref[0])

    h_sc[...] = h

    # ---- graph mean + decoder _precompute + step-0 _get_log_p (last grid step) ----
    @pl.when(l == n_layers - 1)
    def _():
        emb_ref[...] = h                                              # (BN, D) slab
        gemb = jnp.mean(h.reshape(B, N, D), axis=1)                   # (B, D)
        gemb_ref[...] = gemb

        gkvl = jnp.dot(h.astype(bf16), w_np_ref[...],
                       preferred_element_type=f32)                    # (BN, 3D)
        gk3 = gkvl[:, 0:D].reshape(B, N, D).astype(bf16)
        gv3 = gkvl[:, D:2 * D].reshape(B, N, D).astype(bf16)
        lk3 = gkvl[:, 2 * D:3 * D].reshape(B, N, D).astype(bf16)

        fixed_ctx = jnp.dot(gemb.astype(bf16), w_fc_ref[...],
                            preferred_element_type=f32)               # (B, D)
        step_ctx = jnp.dot(w_place_ref[...], w_step_ref[...],
                           preferred_element_type=f32)                # (1, D)
        query = fixed_ctx + step_ctx                                  # (B, D)

        # multi-head glimpse: one query per batch, same lane-masked-rows trick
        q_rep_d = (query[:, None, :] * hm[None, :, :]).astype(bf16)   # (B, H, D)
        c_d = jnp.einsum('bhd,bjd->bhj', q_rep_d, gk3,
                         preferred_element_type=f32) * inv_sqrt_dk    # (B, H, N)
        a_d = softmax_last(c_d)
        ho_d = jnp.einsum('bhj,bjd->bhd', a_d.astype(bf16), gv3,
                          preferred_element_type=f32)                 # (B, H, D)
        heads_d = jnp.sum(ho_d * hm[None, :, :], axis=1)              # (B, D)
        glimpse = jnp.dot(heads_d.astype(bf16), w_po_ref[...],
                          preferred_element_type=f32)                 # (B, D)

        logits = jnp.einsum('bqd,bkd->bqk', glimpse[:, None, :].astype(bf16), lk3,
                            preferred_element_type=f32)[:, 0, :] * inv_sqrt_d
        logits = jnp.tanh(logits) * tanh_clipping
        # TODO(synk): PHYLO state.get_mask() unavailable -> step-0 logits unmasked.
        m = jnp.max(logits, axis=-1, keepdims=True)
        lse = m + jnp.log(jnp.sum(jnp.exp(logits - m), axis=-1, keepdims=True))
        logp_ref[...] = logits - lse                                  # (B, N)


# ----------------------------- wrapper -------------------------------


def _layer_spec(shape):
    nd = len(shape)
    return pl.BlockSpec((1,) + tuple(shape[1:]),
                        lambda l, _nd=nd: (l,) + (0,) * (_nd - 1))


def _const_spec(shape):
    nd = len(shape)
    return pl.BlockSpec(tuple(shape), lambda l, _nd=nd: (0,) * _nd)


@functools.partial(jax.jit, static_argnames=("n_heads", "tanh_clipping"))
def attention_model_forward(x, params, *, n_heads=8, tanh_clipping=10.0):
    """x: (B, N, node_dim) -> (embeddings (B,N,D), graph_embed (B,D), log_p (B,1,N))."""
    f32, bf16 = jnp.float32, jnp.bfloat16
    B, N, node_dim = x.shape
    D = params["init_w"].shape[1]
    H = n_heads
    dk = D // H
    layers = params["layers"]
    L = len(layers)
    BN = B * N
    F = layers[0]["ff_w1"].shape[1]

    # pack per-head PyTorch-layout weights into head-major (D, D) matmul operands
    def pack_qkv(w):   # (H, D, dk) -> (D, H*dk): column h*dk+c is W[h][:, c]
        return jnp.transpose(w, (1, 0, 2)).reshape(D, D)

    wqkv = jnp.stack([jnp.concatenate(
        [pack_qkv(lyr["wq"]), pack_qkv(lyr["wk"]), pack_qkv(lyr["wv"])], axis=1)
        for lyr in layers]).astype(bf16)                              # (L, D, 3D)
    wo = jnp.stack([lyr["wo"].reshape(D, D) for lyr in layers]).astype(bf16)
    bn1_g = jnp.stack([lyr["bn1_g"] for lyr in layers])               # (L, 1, D) f32
    bn1_b = jnp.stack([lyr["bn1_b"] for lyr in layers])
    ff_w1 = jnp.stack([lyr["ff_w1"] for lyr in layers]).astype(bf16)  # (L, D, F)
    ff_b1 = jnp.stack([lyr["ff_b1"] for lyr in layers])               # (L, 1, F) f32
    ff_w2 = jnp.stack([lyr["ff_w2"] for lyr in layers]).astype(bf16)  # (L, F, D)
    ff_b2 = jnp.stack([lyr["ff_b2"] for lyr in layers])
    bn2_g = jnp.stack([lyr["bn2_g"] for lyr in layers])
    bn2_b = jnp.stack([lyr["bn2_b"] for lyr in layers])

    init_w = params["init_w"].astype(bf16)
    init_b = params["init_b"]
    w_np = params["W_node_proj"].astype(bf16)       # (D, 3D), kept fused
    w_fc = params["W_fixed_ctx"].astype(bf16)
    w_place = params["W_placeholder"].astype(bf16)
    w_step = params["W_step_ctx"].astype(bf16)
    w_po = params["W_proj_out"].astype(bf16)

    # constant 0/1 head masks (folded by the compiler)
    head_id = jnp.arange(D, dtype=jnp.int32) // dk
    hmask = (head_id[None, :] == jnp.arange(H, dtype=jnp.int32)[:, None]).astype(f32)
    rowmask = jnp.repeat(hmask, N, axis=0)                            # (H*N, D)

    resident_pre = (x, init_w, init_b)
    layer_stacked = (wqkv, wo, bn1_g, bn1_b, ff_w1, ff_b1, ff_w2, ff_b2, bn2_g, bn2_b)
    resident_post = (w_np, w_fc, w_place, w_step, w_po, hmask, rowmask)
    inputs = resident_pre + layer_stacked + resident_post
    in_specs = ([_const_spec(a.shape) for a in resident_pre]
                + [_layer_spec(a.shape) for a in layer_stacked]
                + [_const_spec(a.shape) for a in resident_post])

    out_shape = (
        jax.ShapeDtypeStruct((BN, D), f32),   # embeddings, lane-dense 2-D slab
        jax.ShapeDtypeStruct((B, D), f32),    # graph embedding
        jax.ShapeDtypeStruct((B, N), f32),    # step-0 log-probs
    )
    out_specs = [_const_spec(s.shape) for s in out_shape]

    flops = int(L * (2 * BN * D * 3 * D + 4 * B * (H * N) * N * D
                     + 2 * BN * D * D + 4 * BN * D * F)
                + 2 * BN * D * 3 * D + 6 * B * D * D + 4 * B * H * N * D)
    transcendentals = int(L * B * H * N * N + B * H * N + 2 * B * N)
    bytes_accessed = int(sum(a.size * a.dtype.itemsize for a in inputs)
                         + (BN * D + B * D + B * N) * 4)

    kernel = functools.partial(_fused_forward_kernel, n_heads=n_heads,
                               tanh_clipping=tanh_clipping)
    emb2d, gemb, logp = pl.pallas_call(
        kernel,
        out_shape=out_shape,
        grid=(L,),
        in_specs=in_specs,
        out_specs=out_specs,
        scratch_shapes=[pltpu.VMEM((BN, D), f32)],   # activation carry across layers
        compiler_params=pltpu.CompilerParams(
            dimension_semantics=("arbitrary",),      # layer loop carries state
            # re-derive for deployment shapes; comfortably under v7x's 64 MiB
            vmem_limit_bytes=48 * 1024 * 1024),
        cost_estimate=pl.CostEstimate(flops=flops,
                                      transcendentals=transcendentals,
                                      bytes_accessed=bytes_accessed),
    )(*inputs)
    return emb2d.reshape(B, N, D), gemb, logp[:, None, :]


# ----------------------------- parameters -------------------------------


def init_params(key, node_dim, embed_dim, n_heads, n_layers, ff_hidden):
    dk = embed_dim // n_heads
    keys = iter(jax.random.split(key, 64))

    def u(shape, scale):
        return jax.random.uniform(next(keys), shape, jnp.float32, -scale, scale)

    p = {
        "init_w": u((node_dim, embed_dim), 1.0 / math.sqrt(node_dim)),
        "init_b": u((1, embed_dim), 1.0 / math.sqrt(node_dim)),
        "layers": [],
        "W_placeholder": jax.random.uniform(next(keys), (1, 2 * embed_dim),
                                            jnp.float32, -1.0, 1.0),
        "W_fixed_ctx": u((embed_dim, embed_dim), 1.0 / math.sqrt(embed_dim)),
        "W_node_proj": u((embed_dim, 3 * embed_dim), 1.0 / math.sqrt(embed_dim)),
        "W_step_ctx": u((2 * embed_dim, embed_dim), 1.0 / math.sqrt(2 * embed_dim)),
        "W_proj_out": u((embed_dim, embed_dim), 1.0 / math.sqrt(embed_dim)),
    }
    for _ in range(n_layers):
        p["layers"].append({
            "wq": u((n_heads, embed_dim, dk), 1.0 / math.sqrt(dk)),
            "wk": u((n_heads, embed_dim, dk), 1.0 / math.sqrt(dk)),
            "wv": u((n_heads, embed_dim, dk), 1.0 / math.sqrt(dk)),
            "wo": u((n_heads, dk, embed_dim), 1.0 / math.sqrt(embed_dim)),
            "bn1_g": jnp.ones((1, embed_dim), jnp.float32),
            "bn1_b": jnp.zeros((1, embed_dim), jnp.float32),
            "ff_w1": u((embed_dim, ff_hidden), 1.0 / math.sqrt(embed_dim)),
            "ff_b1": u((1, ff_hidden), 1.0 / math.sqrt(embed_dim)),
            "ff_w2": u((ff_hidden, embed_dim), 1.0 / math.sqrt(ff_hidden)),
            "ff_b2": u((1, embed_dim), 1.0 / math.sqrt(ff_hidden)),
            "bn2_g": jnp.ones((1, embed_dim), jnp.float32),
            "bn2_b": jnp.zeros((1, embed_dim), jnp.float32),
        })
    return p


if __name__ == "__main__":
    B, N, node_dim = 2, 8, 4
    embed_dim, n_heads, n_layers, ff_hidden = 32, 8, 2, 512

    key = jax.random.PRNGKey(0)
    kx, kp = jax.random.split(key)
    x = jax.random.uniform(kx, (B, N, node_dim), jnp.float32)
    params = init_params(kp, node_dim, embed_dim, n_heads, n_layers, ff_hidden)

    emb, gemb, log_p = attention_model_forward(x, params, n_heads=n_heads,
                                               tanh_clipping=10.0)
    jax.block_until_ready((emb, gemb, log_p))

    assert emb.shape == (B, N, embed_dim)
    assert gemb.shape == (B, embed_dim)
    assert log_p.shape == (B, 1, N)
    assert bool(jnp.all(jnp.isfinite(emb)))
    assert bool(jnp.all(jnp.isfinite(log_p)))
    # log-softmax rows should sum (in prob space) to ~1
    assert bool(jnp.allclose(jnp.sum(jnp.exp(log_p), axis=-1), 1.0, atol=1e-3))
    # encoder ends with BatchNorm (gamma=1, beta=0 at init): per-feature batch mean ~ 0
    feat_mean = jnp.mean(emb.reshape(B * N, embed_dim), axis=0)
    assert bool(jnp.max(jnp.abs(feat_mean)) < 1e-3)
    # graph embedding is the node-mean of the embeddings
    assert bool(jnp.allclose(gemb, jnp.mean(emb, axis=1), atol=1e-5))
    print("KERNEL_OK")
</pallas_src>

<mosaic_0001>
module attributes {stable_mosaic.version = 11 : i64} {
  func.func @_fused_forward_kernel(%arg0: i32, %arg1: memref<2x8x4xf32, #tpu.memory_space<vmem>>, %arg2: memref<4x32xbf16, #tpu.memory_space<vmem>>, %arg3: memref<1x32xf32, #tpu.memory_space<vmem>>, %arg4: memref<1x32x96xbf16, #tpu.memory_space<vmem>>, %arg5: memref<1x32x32xbf16, #tpu.memory_space<vmem>>, %arg6: memref<1x1x32xf32, #tpu.memory_space<vmem>>, %arg7: memref<1x1x32xf32, #tpu.memory_space<vmem>>, %arg8: memref<1x32x512xbf16, #tpu.memory_space<vmem>>, %arg9: memref<1x1x512xf32, #tpu.memory_space<vmem>>, %arg10: memref<1x512x32xbf16, #tpu.memory_space<vmem>>, %arg11: memref<1x1x32xf32, #tpu.memory_space<vmem>>, %arg12: memref<1x1x32xf32, #tpu.memory_space<vmem>>, %arg13: memref<1x1x32xf32, #tpu.memory_space<vmem>>, %arg14: memref<32x96xbf16, #tpu.memory_space<vmem>>, %arg15: memref<32x32xbf16, #tpu.memory_space<vmem>>, %arg16: memref<1x64xbf16, #tpu.memory_space<vmem>>, %arg17: memref<64x32xbf16, #tpu.memory_space<vmem>>, %arg18: memref<32x32xbf16, #tpu.memory_space<vmem>>, %arg19: memref<8x32xf32, #tpu.memory_space<vmem>>, %arg20: memref<64x32xf32, #tpu.memory_space<vmem>>, %arg21: memref<16x32xf32, #tpu.memory_space<vmem>>, %arg22: memref<2x32xf32, #tpu.memory_space<vmem>>, %arg23: memref<2x8xf32, #tpu.memory_space<vmem>>, %arg24: memref<16x32xf32, #tpu.memory_space<vmem>>) attributes {dimension_semantics = [#tpu.dimension_semantics<arbitrary>], iteration_bounds = array<i64: 2>, scalar_prefetch = 0 : i64, scratch_operands = 1 : i64, tpu.core_type = #tpu.core_type<tc>, window_params = [{pipeline_mode = #tpu.pipeline_mode<synchronous>, transform_indices = @transform_0, window_bounds = array<i64: 2, 8, 4>}, {pipeline_mode = #tpu.pipeline_mode<synchronous>, transform_indices = @transform_1, window_bounds = array<i64: 4, 32>}, {pipeline_mode = #tpu.pipeline_mode<synchronous>, transform_indices = @transform_2, window_bounds = array<i64: 1, 32>}, {transform_indices = @transform_3, window_bounds = array<i64: 1, 32, 96>}, {transform_indices = @transform_4, window_bounds = array<i64: 1, 32, 32>}, {transform_indices = @transform_5, window_bounds = array<i64: 1, 1, 32>}, {transform_indices = @transform_6, window_bounds = array<i64: 1, 1, 32>}, {transform_indices = @transform_7, window_bounds = array<i64: 1, 32, 512>}, {transform_indices = @transform_8, window_bounds = array<i64: 1, 1, 512>}, {transform_indices = @transform_9, window_bounds = array<i64: 1, 512, 32>}, {transform_indices = @transform_10, window_bounds = array<i64: 1, 1, 32>}, {transform_indices = @transform_11, window_bounds = array<i64: 1, 1, 32>}, {transform_indices = @transform_12, window_bounds = array<i64: 1, 1, 32>}, {pipeline_mode = #tpu.pipeline_mode<synchronous>, transform_indices = @transform_13, window_bounds = array<i64: 32, 96>}, {pipeline_mode = #tpu.pipeline_mode<synchronous>, transform_indices = @transform_14, window_bounds = array<i64: 32, 32>}, {pipeline_mode = #tpu.pipeline_mode<synchronous>, transform_indices = @transform_15, window_bounds = array<i64: 1, 64>}, {pipeline_mode = #tpu.pipeline_mode<synchronous>, transform_indices = @transform_16, window_bounds = array<i64: 64, 32>}, {pipeline_mode = #tpu.pipeline_mode<synchronous>, transform_indices = @transform_17, window_bounds = array<i64: 32, 32>}, {pipeline_mode = #tpu.pipeline_mode<synchronous>, transform_indices = @transform_18, window_bounds = array<i64: 8, 32>}, {pipeline_mode = #tpu.pipeline_mode<synchronous>, transform_indices = @transform_19, window_bounds = array<i64: 64, 32>}, {pipeline_mode = #tpu.pipeline_mode<synchronous>, transform_indices = @transform_20, window_bounds = array<i64: 16, 32>}, {pipeline_mode = #tpu.pipeline_mode<synchronous>, transform_indices = @transform_21, window_bounds = array<i64: 2, 32>}, {pipeline_mode = #tpu.pipeline_mode<synchronous>, transform_indices = @transform_22, window_bounds = array<i64: 2, 8>}]} {
    %c0 = arith.constant 0 : index
    %c0_0 = arith.constant 0 : index
    %0 = vector.load %arg19[%c0, %c0_0] : memref<8x32xf32, #tpu.memory_space<vmem>>, vector<8x32xf32>
    %c0_1 = arith.constant 0 : index
    %c0_2 = arith.constant 0 : index
    %1 = vector.load %arg20[%c0_1, %c0_2] : memref<64x32xf32, #tpu.memory_space<vmem>>, vector<64x32xf32>
    %c0_i32 = arith.constant 0 : i32
    %2 = arith.cmpi eq, %arg0, %c0_i32 : i32
    %3 = arith.extui %2 : i1 to i32
    %c0_i32_3 = arith.constant 0 : i32
    %4 = arith.cmpi ne, %3, %c0_i32_3 : i32
    scf.if %4 {
      %c0_61 = arith.constant 0 : index
      %c0_62 = arith.constant 0 : index
      %c0_63 = arith.constant 0 : index
      %129 = vector.load %arg1[%c0_61, %c0_62, %c0_63] : memref<2x8x4xf32, #tpu.memory_space<vmem>>, vector<2x8x4xf32>
      %130 = vector.shape_cast %129 : vector<2x8x4xf32> to vector<16x4xf32>
      %131 = arith.truncf %130 : vector<16x4xf32> to vector<16x4xbf16>
      %c0_64 = arith.constant 0 : index
      %c0_65 = arith.constant 0 : index
      %132 = vector.load %arg2[%c0_64, %c0_65] : memref<4x32xbf16, #tpu.memory_space<vmem>>, vector<4x32xbf16>
      %cst_66 = arith.constant dense<0.000000e+00> : vector<16x32xf32>
      %133 = tpu.matmul %131, %132, %cst_66 {dimension_numbers = #tpu.dot_dimension_numbers<[1], [0], [0], [1], [0, 0, 1, 1], [], []>} : vector<16x4xbf16>, vector<4x32xbf16>, vector<16x32xf32> -> vector<16x32xf32>
      %c0_67 = arith.constant 0 : index
      %c0_68 = arith.constant 0 : index
      %134 = vector.load %arg3[%c0_67, %c0_68] : memref<1x32xf32, #tpu.memory_space<vmem>>, vector<1x32xf32>
      %135 = vector.broadcast %134 : vector<1x32xf32> to vector<16x32xf32>
      %136 = arith.addf %133, %135 : vector<16x32xf32>
      %c0_69 = arith.constant 0 : index
      %c0_70 = arith.constant 0 : index
      %137 = vector.load %arg24[%c0_69, %c0_70] : memref<16x32xf32, #tpu.memory_space<vmem>>, vector<16x32xf32>
      tpu.vector_store %arg24[%c0_69, %c0_70], %136 {strides = array<i32>} : memref<16x32xf32, #tpu.memory_space<vmem>>, vector<16x32xf32>,
    } else {
    }
    %c0_4 = arith.constant 0 : index
    %c0_5 = arith.constant 0 : index
    %5 = vector.load %arg24[%c0_4, %c0_5] : memref<16x32xf32, #tpu.memory_space<vmem>>, vector<16x32xf32>
    %6 = arith.truncf %5 : vector<16x32xf32> to vector<16x32xbf16>
    %c0_6 = arith.constant 0 : index
    %c0_7 = arith.constant 0 : index
    %c0_8 = arith.constant 0 : index
    %7 = vector.load %arg4[%c0_6, %c0_7, %c0_8] : memref<1x32x96xbf16, #tpu.memory_space<vmem>>, vector<1x32x96xbf16>
    %8 = vector.shape_cast %7 : vector<1x32x96xbf16> to vector<32x96xbf16>
    %cst = arith.constant dense<0.000000e+00> : vector<16x96xf32>
    %9 = tpu.matmul %6, %8, %cst {dimension_numbers = #tpu.dot_dimension_numbers<[1], [0], [0], [1], [0, 0, 1, 1], [], []>} : vector<16x32xbf16>, vector<32x96xbf16>, vector<16x96xf32> -> vector<16x96xf32>
    %10 = vector.extract_strided_slice %9 {offsets = [0, 0], sizes = [16, 32], strides = [1, 1]} : vector<16x96xf32> to vector<16x32xf32>
    %11 = vector.shape_cast %10 : vector<16x32xf32> to vector<2x8x32xf32>
    %12 = vector.extract_strided_slice %9 {offsets = [0, 32], sizes = [16, 32], strides = [1, 1]} : vector<16x96xf32> to vector<16x32xf32>
    %13 = vector.shape_cast %12 : vector<16x32xf32> to vector<2x8x32xf32>
    %14 = arith.truncf %13 : vector<2x8x32xf32> to vector<2x8x32xbf16>
    %15 = vector.extract_strided_slice %9 {offsets = [0, 64], sizes = [16, 32], strides = [1, 1]} : vector<16x96xf32> to vector<16x32xf32>
    %16 = vector.shape_cast %15 : vector<16x32xf32> to vector<2x8x32xf32>
    %17 = arith.truncf %16 : vector<2x8x32xf32> to vector<2x8x32xbf16>
    %18 = vector.shape_cast %11 : vector<2x8x32xf32> to vector<2x1x8x32xf32>
    %19 = vector.shape_cast %0 : vector<8x32xf32> to vector<1x8x1x32xf32>
    %20 = vector.broadcast %18 : vector<2x1x8x32xf32> to vector<2x8x8x32xf32>
    %21 = vector.broadcast %19 : vector<1x8x1x32xf32> to vector<2x8x8x32xf32>
    %22 = arith.mulf %20, %21 : vector<2x8x8x32xf32>
    %23 = vector.shape_cast %22 : vector<2x8x8x32xf32> to vector<2x64x32xf32>
    %24 = arith.truncf %23 : vector<2x64x32xf32> to vector<2x64x32xbf16>
    "tpu.trace_start"() <{level = 10 : i32, message = "bmd,bkd->bmk"}> : () -> ()
    %cst_9 = arith.constant dense<0.000000e+00> : vector<2x64x8xf32>
    %25 = tpu.matmul %24, %14, %cst_9 {dimension_numbers = #tpu.dot_dimension_numbers<[2], [2], [1], [1], [0, 0, 0, 1, 1, 1], [0], [0]>} : vector<2x64x32xbf16>, vector<2x8x32xbf16>, vector<2x64x8xf32> -> vector<2x64x8xf32>
    "tpu.trace_stop"() : () -> ()
    %cst_10 = arith.constant 5.000000e-01 : f32
    %26 = vector.broadcast %cst_10 : f32 to vector<2x64x8xf32>
    %27 = arith.mulf %25, %26 : vector<2x64x8xf32>
    %cst_11 = arith.constant dense<0xFF800000> : vector<2x64xf32>
    %28 = vector.multi_reduction <maximumf>, %27, %cst_11 [2] : vector<2x64x8xf32> to vector<2x64xf32>
    %29 = vector.shape_cast %28 : vector<2x64xf32> to vector<2x64x1xf32>
    %30 = vector.broadcast %29 : vector<2x64x1xf32> to vector<2x64x8xf32>
    %31 = arith.subf %27, %30 : vector<2x64x8xf32>
    %32 = math.exp %31 : vector<2x64x8xf32>
    %cst_12 = arith.constant dense<0.000000e+00> : vector<2x64xf32>
    %33 = vector.multi_reduction <add>, %32, %cst_12 [2] : vector<2x64x8xf32> to vector<2x64xf32>
    %34 = vector.shape_cast %33 : vector<2x64xf32> to vector<2x64x1xf32>
    %35 = vector.broadcast %34 : vector<2x64x1xf32> to vector<2x64x8xf32>
    %36 = arith.divf %32, %35 : vector<2x64x8xf32>
    %37 = arith.truncf %36 : vector<2x64x8xf32> to vector<2x64x8xbf16>
    "tpu.trace_start"() <{level = 10 : i32, message = "bmj,bjd->bmd"}> : () -> ()
    %cst_13 = arith.constant dense<0.000000e+00> : vector<2x64x32xf32>
    %38 = tpu.matmul %37, %17, %cst_13 {dimension_numbers = #tpu.dot_dimension_numbers<[2], [1], [1], [2], [0, 0, 0, 1, 1, 2], [0], [0]>} : vector<2x64x8xbf16>, vector<2x8x32xbf16>, vector<2x64x32xf32> -> vector<2x64x32xf32>
    "tpu.trace_stop"() : () -> ()
    %39 = vector.shape_cast %1 : vector<64x32xf32> to vector<1x64x32xf32>
    %40 = vector.broadcast %39 : vector<1x64x32xf32> to vector<2x64x32xf32>
    %41 = arith.mulf %38, %40 : vector<2x64x32xf32>
    %42 = vector.shape_cast %41 : vector<2x64x32xf32> to vector<2x8x8x32xf32>
    %cst_14 = arith.constant dense<0.000000e+00> : vector<2x8x32xf32>
    %43 = vector.multi_reduction <add>, %42, %cst_14 [1] : vector<2x8x8x32xf32> to vector<2x8x32xf32>
    %44 = vector.shape_cast %43 : vector<2x8x32xf32> to vector<16x32xf32>
    %45 = arith.truncf %44 : vector<16x32xf32> to vector<16x32xbf16>
    %c0_15 = arith.constant 0 : index
    %c0_16 = arith.constant 0 : index
    %c0_17 = arith.constant 0 : index
    %46 = vector.load %arg5[%c0_15, %c0_16, %c0_17] : memref<1x32x32xbf16, #tpu.memory_space<vmem>>, vector<1x32x32xbf16>
    %47 = vector.shape_cast %46 : vector<1x32x32xbf16> to vector<32x32xbf16>
    %cst_18 = arith.constant dense<0.000000e+00> : vector<16x32xf32>
    %48 = tpu.matmul %45, %47, %cst_18 {dimension_numbers = #tpu.dot_dimension_numbers<[1], [0], [0], [1], [0, 0, 1, 1], [], []>} : vector<16x32xbf16>, vector<32x32xbf16>, vector<16x32xf32> -> vector<16x32xf32>
    %49 = arith.addf %5, %48 : vector<16x32xf32>
    %c0_19 = arith.constant 0 : index
    %c0_20 = arith.constant 0 : index
    %c0_21 = arith.constant 0 : index
    %50 = vector.load %arg6[%c0_19, %c0_20, %c0_21] : memref<1x1x32xf32, #tpu.memory_space<vmem>>, vector<1x1x32xf32>
    %51 = vector.shape_cast %50 : vector<1x1x32xf32> to vector<1x32xf32>
    %c0_22 = arith.constant 0 : index
    %c0_23 = arith.constant 0 : index
    %c0_24 = arith.constant 0 : index
    %52 = vector.load %arg7[%c0_22, %c0_23, %c0_24] : memref<1x1x32xf32, #tpu.memory_space<vmem>>, vector<1x1x32xf32>
    %53 = vector.shape_cast %52 : vector<1x1x32xf32> to vector<1x32xf32>
    %cst_25 = arith.constant dense<0.000000e+00> : vector<32xf32>
    %54 = vector.multi_reduction <add>, %49, %cst_25 [0] : vector<16x32xf32> to vector<32xf32>
    %55 = vector.shape_cast %54 : vector<32xf32> to vector<1x32xf32>
    %56 = arith.mulf %49, %49 : vector<16x32xf32>
    %cst_26 = arith.constant dense<0.000000e+00> : vector<32xf32>
    %57 = vector.multi_reduction <add>, %56, %cst_26 [0] : vector<16x32xf32> to vector<32xf32>
    %58 = vector.shape_cast %57 : vector<32xf32> to vector<1x32xf32>
    %cst_27 = arith.constant 6.250000e-02 : f32
    %59 = vector.broadcast %cst_27 : f32 to vector<1x32xf32>
    %60 = arith.mulf %55, %59 : vector<1x32xf32>
    %cst_28 = arith.constant 6.250000e-02 : f32
    %61 = vector.broadcast %cst_28 : f32 to vector<1x32xf32>
    %62 = arith.mulf %58, %61 : vector<1x32xf32>
    %63 = arith.mulf %60, %60 : vector<1x32xf32>
    %64 = arith.subf %62, %63 : vector<1x32xf32>
    %cst_29 = arith.constant 0.000000e+00 : f32
    %65 = vector.broadcast %cst_29 : f32 to vector<1x32xf32>
    %66 = arith.maximumf %64, %65 : vector<1x32xf32>
    %67 = vector.broadcast %60 : vector<1x32xf32> to vector<16x32xf32>
    %68 = arith.subf %49, %67 : vector<16x32xf32>
    %cst_30 = arith.constant 9.99999974E-6 : f32
    %69 = vector.broadcast %cst_30 : f32 to vector<1x32xf32>
    %70 = arith.addf %66, %69 : vector<1x32xf32>
    %71 = math.rsqrt %70 : vector<1x32xf32>
    %72 = vector.broadcast %71 : vector<1x32xf32> to vector<16x32xf32>
    %73 = arith.mulf %68, %72 : vector<16x32xf32>
    %74 = vector.broadcast %51 : vector<1x32xf32> to vector<16x32xf32>
    %75 = arith.mulf %73, %74 : vector<16x32xf32>
    %76 = vector.broadcast %53 : vector<1x32xf32> to vector<16x32xf32>
    %77 = arith.addf %75, %76 : vector<16x32xf32>
    %78 = arith.truncf %77 : vector<16x32xf32> to vector<16x32xbf16>
    %c0_31 = arith.constant 0 : index
    %c0_32 = arith.constant 0 : index
    %c0_33 = arith.constant 0 : index
    %79 = vector.load %arg8[%c0_31, %c0_32, %c0_33] : memref<1x32x512xbf16, #tpu.memory_space<vmem>>, vector<1x32x512xbf16>
    %80 = vector.shape_cast %79 : vector<1x32x512xbf16> to vector<32x512xbf16>
    %cst_34 = arith.constant dense<0.000000e+00> : vector<16x512xf32>
    %81 = tpu.matmul %78, %80, %cst_34 {dimension_numbers = #tpu.dot_dimension_numbers<[1], [0], [0], [1], [0, 0, 1, 1], [], []>} : vector<16x32xbf16>, vector<32x512xbf16>, vector<16x512xf32> -> vector<16x512xf32>
    %c0_35 = arith.constant 0 : index
    %c0_36 = arith.constant 0 : index
    %c0_37 = arith.constant 0 : index
    %82 = vector.load %arg9[%c0_35, %c0_36, %c0_37] : memref<1x1x512xf32, #tpu.memory_space<vmem>>, vector<1x1x512xf32>
    %83 = vector.shape_cast %82 : vector<1x1x512xf32> to vector<1x512xf32>
    %84 = vector.broadcast %83 : vector<1x512xf32> to vector<16x512xf32>
    %85 = arith.addf %81, %84 : vector<16x512xf32>
    %cst_38 = arith.constant 0.000000e+00 : f32
    %86 = vector.broadcast %cst_38 : f32 to vector<16x512xf32>
    %87 = arith.maximumf %85, %86 : vector<16x512xf32>
    %88 = arith.truncf %87 : vector<16x512xf32> to vector<16x512xbf16>
    %c0_39 = arith.constant 0 : index
    %c0_40 = arith.constant 0 : index
    %c0_41 = arith.constant 0 : index
    %89 = vector.load %arg10[%c0_39, %c0_40, %c0_41] : memref<1x512x32xbf16, #tpu.memory_space<vmem>>, vector<1x512x32xbf16>
    %90 = vector.shape_cast %89 : vector<1x512x32xbf16> to vector<512x32xbf16>
    %cst_42 = arith.constant dense<0.000000e+00> : vector<16x32xf32>
    %91 = tpu.matmul %88, %90, %cst_42 {dimension_numbers = #tpu.dot_dimension_numbers<[1], [0], [0], [1], [0, 0, 1, 1], [], []>} : vector<16x512xbf16>, vector<512x32xbf16>, vector<16x32xf32> -> vector<16x32xf32>
    %92 = arith.addf %77, %91 : vector<16x32xf32>
    %c0_43 = arith.constant 0 : index
    %c0_44 = arith.constant 0 : index
    %c0_45 = arith.constant 0 : index
    %93 = vector.load %arg11[%c0_43, %c0_44, %c0_45] : memref<1x1x32xf32, #tpu.memory_space<vmem>>, vector<1x1x32xf32>
    %94 = vector.shape_cast %93 : vector<1x1x32xf32> to vector<1x32xf32>
    %95 = vector.broadcast %94 : vector<1x32xf32> to vector<16x32xf32>
    %96 = arith.addf %92, %95 : vector<16x32xf32>
    %c0_46 = arith.constant 0 : index
    %c0_47 = arith.constant 0 : index
    %c0_48 = arith.constant 0 : index
    %97 = vector.load %arg12[%c0_46, %c0_47, %c0_48] : memref<1x1x32xf32, #tpu.memory_space<vmem>>, vector<1x1x32xf32>
    %98 = vector.shape_cast %97 : vector<1x1x32xf32> to vector<1x32xf32>
    %c0_49 = arith.constant 0 : index
    %c0_50 = arith.constant 0 : index
    %c0_51 = arith.constant 0 : index
    %99 = vector.load %arg13[%c0_49, %c0_50, %c0_51] : memref<1x1x32xf32, #tpu.memory_space<vmem>>, vector<1x1x32xf32>
    %100 = vector.shape_cast %99 : vector<1x1x32xf32> to vector<1x32xf32>
    %cst_52 = arith.constant dense<0.000000e+00> : vector<32xf32>
    %101 = vector.multi_reduction <add>, %96, %cst_52 [0] : vector<16x32xf32> to vector<32xf32>
    %102 = vector.shape_cast %101 : vector<32xf32> to vector<1x32xf32>
    %103 = arith.mulf %96, %96 : vector<16x32xf32>
    %cst_53 = arith.constant dense<0.000000e+00> : vector<32xf32>
    %104 = vector.multi_reduction <add>, %103, %cst_53 [0] : vector<16x32xf32> to vector<32xf32>
    %105 = vector.shape_cast %104 : vector<32xf32> to vector<1x32xf32>
    %cst_54 = arith.constant 6.250000e-02 : f32
    %106 = vector.broadcast %cst_54 : f32 to vector<1x32xf32>
    %107 = arith.mulf %102, %106 : vector<1x32xf32>
    %cst_55 = arith.constant 6.250000e-02 : f32
    %108 = vector.broadcast %cst_55 : f32 to vector<1x32xf32>
    %109 = arith.mulf %105, %108 : vector<1x32xf32>
    %110 = arith.mulf %107, %107 : vector<1x32xf32>
    %111 = arith.subf %109, %110 : vector<1x32xf32>
    %cst_56 = arith.constant 0.000000e+00 : f32
    %112 = vector.broadcast %cst_56 : f32 to vector<1x32xf32>
    %113 = arith.maximumf %111, %112 : vector<1x32xf32>
    %114 = vector.broadcast %107 : vector<1x32xf32> to vector<16x32xf32>
    %115 = arith.subf %96, %114 : vector<16x32xf32>
    %cst_57 = arith.constant 9.99999974E-6 : f32
    %116 = vector.broadcast %cst_57 : f32 to vector<1x32xf32>
    %117 = arith.addf %113, %116 : vector<1x32xf32>
    %118 = math.rsqrt %117 : vector<1x32xf32>
    %119 = vector.broadcast %118 : vector<1x32xf32> to vector<16x32xf32>
    %120 = arith.mulf %115, %119 : vector<16x32xf32>
    %121 = vector.broadcast %98 : vector<1x32xf32> to vector<16x32xf32>
    %122 = arith.mulf %120, %121 : vector<16x32xf32>
    %123 = vector.broadcast %100 : vector<1x32xf32> to vector<16x32xf32>
    %124 = arith.addf %122, %123 : vector<16x32xf32>
    %c0_58 = arith.constant 0 : index
    %c0_59 = arith.constant 0 : index
    %125 = vector.load %arg24[%c0_58, %c0_59] : memref<16x32xf32, #tpu.memory_space<vmem>>, vector<16x32xf32>
    tpu.vector_store %arg24[%c0_58, %c0_59], %124 {strides = array<i32>} : memref<16x32xf32, #tpu.memory_space<vmem>>, vector<16x32xf32>,
    %c1_i32 = arith.constant 1 : i32
    %126 = arith.cmpi eq, %arg0, %c1_i32 : i32
    %127 = arith.extui %126 : i1 to i32
    %c0_i32_60 = arith.constant 0 : i32
    %128 = arith.cmpi ne, %127, %c0_i32_60 : i32
    scf.if %128 {
      %c0_61 = arith.constant 0 : index
      %c0_62 = arith.constant 0 : index
      %129 = vector.load %arg21[%c0_61, %c0_62] : memref<16x32xf32, #tpu.memory_space<vmem>>, vector<16x32xf32>
      tpu.vector_store %arg21[%c0_61, %c0_62], %124 {strides = array<i32>} : memref<16x32xf32, #tpu.memory_space<vmem>>, vector<16x32xf32>,
      %130 = vector.shape_cast %124 : vector<16x32xf32> to vector<2x8x32xf32>
      %cst_63 = arith.constant dense<0.000000e+00> : vector<2x32xf32>
      %131 = vector.multi_reduction <add>, %130, %cst_63 [1] : vector<2x8x32xf32> to vector<2x32xf32>
      %cst_64 = arith.constant 8.000000e+00 : f32
      %132 = vector.broadcast %cst_64 : f32 to vector<2x32xf32>
      %133 = arith.divf %131, %132 : vector<2x32xf32>
      %c0_65 = arith.constant 0 : index
      %c0_66 = arith.constant 0 : index
      %134 = vector.load %arg22[%c0_65, %c0_66] : memref<2x32xf32, #tpu.memory_space<vmem>>, vector<2x32xf32>
      tpu.vector_store %arg22[%c0_65, %c0_66], %133 {strides = array<i32>} : memref<2x32xf32, #tpu.memory_space<vmem>>, vector<2x32xf32>,
      %135 = arith.truncf %124 : vector<16x32xf32> to vector<16x32xbf16>
      %c0_67 = arith.constant 0 : index
      %c0_68 = arith.constant 0 : index
      %136 = vector.load %arg14[%c0_67, %c0_68] : memref<32x96xbf16, #tpu.memory_space<vmem>>, vector<32x96xbf16>
      %cst_69 = arith.constant dense<0.000000e+00> : vector<16x96xf32>
      %137 = tpu.matmul %135, %136, %cst_69 {dimension_numbers = #tpu.dot_dimension_numbers<[1], [0], [0], [1], [0, 0, 1, 1], [], []>} : vector<16x32xbf16>, vector<32x96xbf16>, vector<16x96xf32> -> vector<16x96xf32>
      %138 = vector.extract_strided_slice %137 {offsets = [0, 0], sizes = [16, 32], strides = [1, 1]} : vector<16x96xf32> to vector<16x32xf32>
      %139 = vector.shape_cast %138 : vector<16x32xf32> to vector<2x8x32xf32>
      %140 = arith.truncf %139 : vector<2x8x32xf32> to vector<2x8x32xbf16>
      %141 = vector.extract_strided_slice %137 {offsets = [0, 32], sizes = [16, 32], strides = [1, 1]} : vector<16x96xf32> to vector<16x32xf32>
      %142 = vector.shape_cast %141 : vector<16x32xf32> to vector<2x8x32xf32>
      %143 = arith.truncf %142 : vector<2x8x32xf32> to vector<2x8x32xbf16>
      %144 = vector.extract_strided_slice %137 {offsets = [0, 64], sizes = [16, 32], strides = [1, 1]} : vector<16x96xf32> to vector<16x32xf32>
      %145 = vector.shape_cast %144 : vector<16x32xf32> to vector<2x8x32xf32>
      %146 = arith.truncf %145 : vector<2x8x32xf32> to vector<2x8x32xbf16>
      %147 = arith.truncf %133 : vector<2x32xf32> to vector<2x32xbf16>
      %c0_70 = arith.constant 0 : index
      %c0_71 = arith.constant 0 : index
      %148 = vector.load %arg15[%c0_70, %c0_71] : memref<32x32xbf16, #tpu.memory_space<vmem>>, vector<32x32xbf16>
      %cst_72 = arith.constant dense<0.000000e+00> : vector<2x32xf32>
      %149 = tpu.matmul %147, %148, %cst_72 {dimension_numbers = #tpu.dot_dimension_numbers<[1], [0], [0], [1], [0, 0, 1, 1], [], []>} : vector<2x32xbf16>, vector<32x32xbf16>, vector<2x32xf32> -> vector<2x32xf32>
      %c0_73 = arith.constant 0 : index
      %c0_74 = arith.constant 0 : index
      %150 = vector.load %arg16[%c0_73, %c0_74] : memref<1x64xbf16, #tpu.memory_space<vmem>>, vector<1x64xbf16>
      %c0_75 = arith.constant 0 : index
      %c0_76 = arith.constant 0 : index
      %151 = vector.load %arg17[%c0_75, %c0_76] : memref<64x32xbf16, #tpu.memory_space<vmem>>, vector<64x32xbf16>
      %cst_77 = arith.constant dense<0.000000e+00> : vector<1x32xf32>
      %152 = tpu.matmul %150, %151, %cst_77 {dimension_numbers = #tpu.dot_dimension_numbers<[1], [0], [0], [1], [0, 0, 1, 1], [], []>} : vector<1x64xbf16>, vector<64x32xbf16>, vector<1x32xf32> -> vector<1x32xf32>
      %153 = vector.broadcast %152 : vector<1x32xf32> to vector<2x32xf32>
      %154 = arith.addf %149, %153 : vector<2x32xf32>
      %155 = vector.shape_cast %154 : vector<2x32xf32> to vector<2x1x32xf32>
      %156 = vector.shape_cast %0 : vector<8x32xf32> to vector<1x8x32xf32>
      %157 = vector.broadcast %155 : vector<2x1x32xf32> to vector<2x8x32xf32>
      %158 = vector.broadcast %156 : vector<1x8x32xf32> to vector<2x8x32xf32>
      %159 = arith.mulf %157, %158 : vector<2x8x32xf32>
      %160 = arith.truncf %159 : vector<2x8x32xf32> to vector<2x8x32xbf16>
      "tpu.trace_start"() <{level = 10 : i32, message = "bhd,bjd->bhj"}> : () -> ()
      %cst_78 = arith.constant dense<0.000000e+00> : vector<2x8x8xf32>
      %161 = tpu.matmul %160, %140, %cst_78 {dimension_numbers = #tpu.dot_dimension_numbers<[2], [2], [1], [1], [0, 0, 0, 1, 1, 1], [0], [0]>} : vector<2x8x32xbf16>, vector<2x8x32xbf16>, vector<2x8x8xf32> -> vector<2x8x8xf32>
      "tpu.trace_stop"() : () -> ()
      %cst_79 = arith.constant 5.000000e-01 : f32
      %162 = vector.broadcast %cst_79 : f32 to vector<2x8x8xf32>
      %163 = arith.mulf %161, %162 : vector<2x8x8xf32>
      %cst_80 = arith.constant dense<0xFF800000> : vector<2x8xf32>
      %164 = vector.multi_reduction <maximumf>, %163, %cst_80 [2] : vector<2x8x8xf32> to vector<2x8xf32>
      %165 = vector.shape_cast %164 : vector<2x8xf32> to vector<2x8x1xf32>
      %166 = vector.broadcast %165 : vector<2x8x1xf32> to vector<2x8x8xf32>
      %167 = arith.subf %163, %166 : vector<2x8x8xf32>
      %168 = math.exp %167 : vector<2x8x8xf32>
      %cst_81 = arith.constant dense<0.000000e+00> : vector<2x8xf32>
      %169 = vector.multi_reduction <add>, %168, %cst_81 [2] : vector<2x8x8xf32> to vector<2x8xf32>
      %170 = vector.shape_cast %169 : vector<2x8xf32> to vector<2x8x1xf32>
      %171 = vector.broadcast %170 : vector<2x8x1xf32> to vector<2x8x8xf32>
      %172 = arith.divf %168, %171 : vector<2x8x8xf32>
      %173 = arith.truncf %172 : vector<2x8x8xf32> to vector<2x8x8xbf16>
      "tpu.trace_start"() <{level = 10 : i32, message = "bhj,bjd->bhd"}> : () -> ()
      %cst_82 = arith.constant dense<0.000000e+00> : vector<2x8x32xf32>
      %174 = tpu.matmul %173, %143, %cst_82 {dimension_numbers = #tpu.dot_dimension_numbers<[2], [1], [1], [2], [0, 0, 0, 1, 1, 2], [0], [0]>} : vector<2x8x8xbf16>, vector<2x8x32xbf16>, vector<2x8x32xf32> -> vector<2x8x32xf32>
      "tpu.trace_stop"() : () -> ()
      %175 = vector.shape_cast %0 : vector<8x32xf32> to vector<1x8x32xf32>
      %176 = vector.broadcast %175 : vector<1x8x32xf32> to vector<2x8x32xf32>
      %177 = arith.mulf %174, %176 : vector<2x8x32xf32>
      %cst_83 = arith.constant dense<0.000000e+00> : vector<2x32xf32>
      %178 = vector.multi_reduction <add>, %177, %cst_83 [1] : vector<2x8x32xf32> to vector<2x32xf32>
      %179 = arith.truncf %178 : vector<2x32xf32> to vector<2x32xbf16>
      %c0_84 = arith.constant 0 : index
      %c0_85 = arith.constant 0 : index
      %180 = vector.load %arg18[%c0_84, %c0_85] : memref<32x32xbf16, #tpu.memory_space<vmem>>, vector<32x32xbf16>
      %cst_86 = arith.constant dense<0.000000e+00> : vector<2x32xf32>
      %181 = tpu.matmul %179, %180, %cst_86 {dimension_numbers = #tpu.dot_dimension_numbers<[1], [0], [0], [1], [0, 0, 1, 1], [], []>} : vector<2x32xbf16>, vector<32x32xbf16>, vector<2x32xf32> -> vector<2x32xf32>
      %182 = vector.shape_cast %181 : vector<2x32xf32> to vector<2x1x32xf32>
      %183 = arith.truncf %182 : vector<2x1x32xf32> to vector<2x1x32xbf16>
      "tpu.trace_start"() <{level = 10 : i32, message = "bqd,bkd->bqk"}> : () -> ()
      %cst_87 = arith.constant dense<0.000000e+00> : vector<2x1x8xf32>
      %184 = tpu.matmul %183, %146, %cst_87 {dimension_numbers = #tpu.dot_dimension_numbers<[2], [2], [1], [1], [0, 0, 0, 1, 1, 1], [0], [0]>} : vector<2x1x32xbf16>, vector<2x8x32xbf16>, vector<2x1x8xf32> -> vector<2x1x8xf32>
      "tpu.trace_stop"() : () -> ()
      %185 = vector.shape_cast %184 : vector<2x1x8xf32> to vector<2x8xf32>
      %cst_88 = arith.constant 0.176776692 : f32
      %186 = vector.broadcast %cst_88 : f32 to vector<2x8xf32>
      %187 = arith.mulf %185, %186 : vector<2x8xf32>
      %188 = math.tanh %187 : vector<2x8xf32>
      %cst_89 = arith.constant 1.000000e+01 : f32
      %189 = vector.broadcast %cst_89 : f32 to vector<2x8xf32>
      %190 = arith.mulf %188, %189 : vector<2x8xf32>
      %cst_90 = arith.constant dense<0xFF800000> : vector<2xf32>
      %191 = vector.multi_reduction <maximumf>, %190, %cst_90 [1] : vector<2x8xf32> to vector<2xf32>
      %192 = vector.shape_cast %191 : vector<2xf32> to vector<2x1xf32>
      %193 = vector.broadcast %192 : vector<2x1xf32> to vector<2x8xf32>
      %194 = arith.subf %190, %193 : vector<2x8xf32>
      %195 = math.exp %194 : vector<2x8xf32>
      %cst_91 = arith.constant dense<0.000000e+00> : vector<2xf32>
      %196 = vector.multi_reduction <add>, %195, %cst_91 [1] : vector<2x8xf32> to vector<2xf32>
      %197 = vector.shape_cast %196 : vector<2xf32> to vector<2x1xf32>
      %198 = math.log %197 : vector<2x1xf32>
      %199 = arith.addf %192, %198 : vector<2x1xf32>
      %200 = vector.broadcast %199 : vector<2x1xf32> to vector<2x8xf32>
      %201 = arith.subf %190, %200 : vector<2x8xf32>
      %c0_92 = arith.constant 0 : index
      %c0_93 = arith.constant 0 : index
      %202 = vector.load %arg23[%c0_92, %c0_93] : memref<2x8xf32, #tpu.memory_space<vmem>>, vector<2x8xf32>
      tpu.vector_store %arg23[%c0_92, %c0_93], %201 {strides = array<i32>} : memref<2x8xf32, #tpu.memory_space<vmem>>, vector<2x8xf32>,
    } else {
    }
    return
  }
  func.func @transform_0(%arg0: i32) -> (i32, i32, i32) {
    %c0_i32 = arith.constant 0 : i32
    %c0_i32_0 = arith.constant 0 : i32
    %c0_i32_1 = arith.constant 0 : i32
    %c0_i32_2 = arith.constant 0 : i32
    return %c0_i32, %c0_i32_0, %c0_i32_1 : i32, i32, i32
  }
  func.func @transform_1(%arg0: i32) -> (i32, i32) {
    %c0_i32 = arith.constant 0 : i32
    %c0_i32_0 = arith.constant 0 : i32
    %c0_i32_1 = arith.constant 0 : i32
    return %c0_i32, %c0_i32_0 : i32, i32
  }
  func.func @transform_2(%arg0: i32) -> (i32, i32) {
    %c0_i32 = arith.constant 0 : i32
    %c0_i32_0 = arith.constant 0 : i32
    %c0_i32_1 = arith.constant 0 : i32
    return %c0_i32, %c0_i32_0 : i32, i32
  }
  func.func @transform_3(%arg0: i32) -> (i32, i32, i32) {
    %c0_i32 = arith.constant 0 : i32
    %c0_i32_0 = arith.constant 0 : i32
    %c0_i32_1 = arith.constant 0 : i32
    return %arg0, %c0_i32, %c0_i32_0 : i32, i32, i32
  }
  func.func @transform_4(%arg0: i32) -> (i32, i32, i32) {
    %c0_i32 = arith.constant 0 : i32
    %c0_i32_0 = arith.constant 0 : i32
    %c0_i32_1 = arith.constant 0 : i32
    return %arg0, %c0_i32, %c0_i32_0 : i32, i32, i32
  }
  func.func @transform_5(%arg0: i32) -> (i32, i32, i32) {
    %c0_i32 = arith.constant 0 : i32
    %c0_i32_0 = arith.constant 0 : i32
    %c0_i32_1 = arith.constant 0 : i32
    return %arg0, %c0_i32, %c0_i32_0 : i32, i32, i32
  }
  func.func @transform_6(%arg0: i32) -> (i32, i32, i32) {
    %c0_i32 = arith.constant 0 : i32
    %c0_i32_0 = arith.constant 0 : i32
    %c0_i32_1 = arith.constant 0 : i32
    return %arg0, %c0_i32, %c0_i32_0 : i32, i32, i32
  }
  func.func @transform_7(%arg0: i32) -> (i32, i32, i32) {
    %c0_i32 = arith.constant 0 : i32
    %c0_i32_0 = arith.constant 0 : i32
    %c0_i32_1 = arith.constant 0 : i32
    return %arg0, %c0_i32, %c0_i32_0 : i32, i32, i32
  }
  func.func @transform_8(%arg0: i32) -> (i32, i32, i32) {
    %c0_i32 = arith.constant 0 : i32
    %c0_i32_0 = arith.constant 0 : i32
    %c0_i32_1 = arith.constant 0 : i32
    return %arg0, %c0_i32, %c0_i32_0 : i32, i32, i32
  }
  func.func @transform_9(%arg0: i32) -> (i32, i32, i32) {
    %c0_i32 = arith.constant 0 : i32
    %c0_i32_0 = arith.constant 0 : i32
    %c0_i32_1 = arith.constant 0 : i32
    return %arg0, %c0_i32, %c0_i32_0 : i32, i32, i32
  }
  func.func @transform_10(%arg0: i32) -> (i32, i32, i32) {
    %c0_i32 = arith.constant 0 : i32
    %c0_i32_0 = arith.constant 0 : i32
    %c0_i32_1 = arith.constant 0 : i32
    return %arg0, %c0_i32, %c0_i32_0 : i32, i32, i32
  }
  func.func @transform_11(%arg0: i32) -> (i32, i32, i32) {
    %c0_i32 = arith.constant 0 : i32
    %c0_i32_0 = arith.constant 0 : i32
    %c0_i32_1 = arith.constant 0 : i32
    return %arg0, %c0_i32, %c0_i32_0 : i32, i32, i32
  }
  func.func @transform_12(%arg0: i32) -> (i32, i32, i32) {
    %c0_i32 = arith.constant 0 : i32
    %c0_i32_0 = arith.constant 0 : i32
    %c0_i32_1 = arith.constant 0 : i32
    return %arg0, %c0_i32, %c0_i32_0 : i32, i32, i32
  }
  func.func @transform_13(%arg0: i32) -> (i32, i32) {
    %c0_i32 = arith.constant 0 : i32
    %c0_i32_0 = arith.constant 0 : i32
    %c0_i32_1 = arith.constant 0 : i32
    return %c0_i32, %c0_i32_0 : i32, i32
  }
  func.func @transform_14(%arg0: i32) -> (i32, i32) {
    %c0_i32 = arith.constant 0 : i32
    %c0_i32_0 = arith.constant 0 : i32
    %c0_i32_1 = arith.constant 0 : i32
    return %c0_i32, %c0_i32_0 : i32, i32
  }
  func.func @transform_15(%arg0: i32) -> (i32, i32) {
    %c0_i32 = arith.constant 0 : i32
    %c0_i32_0 = arith.constant 0 : i32
    %c0_i32_1 = arith.constant 0 : i32
    return %c0_i32, %c0_i32_0 : i32, i32
  }
  func.func @transform_16(%arg0: i32) -> (i32, i32) {
    %c0_i32 = arith.constant 0 : i32
    %c0_i32_0 = arith.constant 0 : i32
    %c0_i32_1 = arith.constant 0 : i32
    return %c0_i32, %c0_i32_0 : i32, i32
  }
  func.func @transform_17(%arg0: i32) -> (i32, i32) {
    %c0_i32 = arith.constant 0 : i32
    %c0_i32_0 = arith.constant 0 : i32
    %c0_i32_1 = arith.constant 0 : i32
    return %c0_i32, %c0_i32_0 : i32, i32
  }
  func.func @transform_18(%arg0: i32) -> (i32, i32) {
    %c0_i32 = arith.constant 0 : i32
    %c0_i32_0 = arith.constant 0 : i32
    %c0_i32_1 = arith.constant 0 : i32
    return %c0_i32, %c0_i32_0 : i32, i32
  }
  func.func @transform_19(%arg0: i32) -> (i32, i32) {
    %c0_i32 = arith.constant 0 : i32
    %c0_i32_0 = arith.constant 0 : i32
    %c0_i32_1 = arith.constant 0 : i32
    return %c0_i32, %c0_i32_0 : i32, i32
  }
  func.func @transform_20(%arg0: i32) -> (i32, i32) {
    %c0_i32 = arith.constant 0 : i32
    %c0_i32_0 = arith.constant 0 : i32
    %c0_i32_1 = arith.constant 0 : i32
    return %c0_i32, %c0_i32_0 : i32, i32
  }
  func.func @transform_21(%arg0: i32) -> (i32, i32) {
    %c0_i32 = arith.constant 0 : i32
    %c0_i32_0 = arith.constant 0 : i32
    %c0_i32_1 = arith.constant 0 : i32
    return %c0_i32, %c0_i32_0 : i32, i32
  }
  func.func @transform_22(%arg0: i32) -> (i32, i32) {
    %c0_i32 = arith.constant 0 : i32
    %c0_i32_0 = arith.constant 0 : i32
    %c0_i32_1 = arith.constant 0 : i32
    return %c0_i32, %c0_i32_0 : i32, i32
  }
}

</mosaic_0001>

<bundles_post_ra>
// kernel: attention_model_forward.1
= control target key start
LH: loop header
LB: loop body
LE: loop exit
PB: predicated region body
PF: predicated region fallthrough
CT: control target
= control target key end

     0   :  { %s4399_s0 = inlined_call_operand.vmem [shape: f32[2,8,4], index: 0, kind: input, shape index: {}]   ;;  %s4400_s1 = inlined_call_operand.vmem [shape: bf16[4,32], index: 1, kind: input, shape index: {}]   ;;  %s4401_s2 = inlined_call_operand.vmem [shape: f32[1,32], index: 2, kind: input, shape index: {}]   ;;  %s4402_s3 = inlined_call_operand.vmem [shape: bf16[2,32,96], index: 3, kind: input, shape index: {}]   ;;  %s4403_s4 = inlined_call_operand.vmem [shape: bf16[2,32,32], index: 4, kind: input, shape index: {}]   ;;  %s4404_s5 = inlined_call_operand.vmem [shape: f32[2,1,32], index: 5, kind: input, shape index: {}]   ;;  %s4405_s6 = inlined_call_operand.vmem [shape: f32[2,1,32], index: 6, kind: input, shape index: {}]   ;;  %s4406_s7 = inlined_call_operand.vmem [shape: bf16[2,32,512], index: 7, kind: input, shape index: {}]   ;;  %s4407_s8 = inlined_call_operand.vmem [shape: f32[2,1,512], index: 8, kind: input, shape index: {}]   ;;  %s4408_s9 = inlined_call_operand.vmem [shape: bf16[2,512,32], index: 9, kind: input, shape index: {}]   ;;  %s4409_s10 = inlined_call_operand.vmem [shape: f32[2,1,32], index: 10, kind: input, shape index: {}]   ;;  %s4410_s11 = inlined_call_operand.vmem [shape: f32[2,1,32], index: 11, kind: input, shape index: {}]   ;;  %s4411_s12 = inlined_call_operand.vmem [shape: f32[2,1,32], index: 12, kind: input, shape index: {}]   ;;  %s4412_s13 = inlined_call_operand.vmem [shape: bf16[32,96], index: 13, kind: input, shape index: {}]   ;;  %s4413_s14 = inlined_call_operand.vmem [shape: bf16[32,32], index: 14, kind: input, shape index: {}]   ;;  %s4414_s15 = inlined_call_operand.vmem [shape: bf16[1,64], index: 15, kind: input, shape index: {}]   ;;  %s4415_s16 = inlined_call_operand.vmem [shape: bf16[64,32], index: 16, kind: input, shape index: {}]   ;;  %s4416_s17 = inlined_call_operand.vmem [shape: bf16[32,32], index: 17, kind: input, shape index: {}]   ;;  %s4417_s18 = inlined_call_operand.vmem [shape: f32[8,32], index: 18, kind: input, shape index: {}]   ;;  %s4418_s19 = inlined_call_operand.vmem [shape: f32[64,32], index: 19, kind: input, shape index: {}]   ;;  %s4419_s20 = inlined_call_operand.hbm [shape: f32[16,32], index: 20, kind: output, shape index: {0}]   ;;  %s4420_s21 = inlined_call_operand.hbm [shape: f32[2,32], index: 21, kind: output, shape index: {1}]   ;;  %s4421_s22 = inlined_call_operand.hbm [shape: f32[2,8], index: 22, kind: output, shape index: {2}]  }
   0x1   :  { %4425 = sst [smem:[#allocation11_spill]] %s4399_s0 }
   0x2   :  { %4426 = sst [smem:[#allocation12_spill]] %s4400_s1 }
   0x3   :  { %4427 = sst [smem:[#allocation13_spill]] %s4401_s2 }
   0x4   :  { %4428 = sst [smem:[#allocation14_spill]] %s4402_s3 }
   0x5   :  { %4429 = sst [smem:[#allocation15_spill]] %s4403_s4 }
   0x6   :  { %4430 = sst [smem:[#allocation16_spill]] %s4404_s5 }
   0x7   :  { %4431 = sst [smem:[#allocation17_spill]] %s4405_s6 }
   0x8   :  { %4432 = sst [smem:[#allocation18_spill]] %s4414_s15 }
   0x9   :  { %4433 = sst [smem:[#allocation19_spill]] %s4416_s17 }
   0xa   :  { %4434 = sst [smem:[#allocation20_spill]] %s4417_s18 }
   0xb   :  { %4435 = sst [smem:[#allocation21_spill]] %s4418_s19 }
   0xc   :  { %4436 = sst [smem:[#allocation22_spill]] %s4419_s20 }
   0xd   :  { %4437 = sst [smem:[#allocation23_spill]] %s4420_s21 }
   0xe   :  { %4438 = sst [smem:[#allocation24_spill]] %s4421_s22 }
   0xf   :  { %28 = vsyncpa [#allocation4], 0 }
  0x10   :  { %29 = vsyncpa [#allocation6], 0  ;;  %s3620_s3 = smov 0  }
  0x11 LB: > { %4439 = sst [smem:[#allocation10_spill]] %s3493_s3  ;;  %s3626_s28 = sadd.s32 4294967295, %s3493_s3   ;;  %s3493_s3 = sphi %s3620_s3, %s35_s3  }
  0x12   : > { %p2936_p0 = scmp.ge.s32.totalorder %s3493_s3, 1  ;;  %p683_p1 = scmp.lt.s32.totalorder %s3493_s3, 3 }
  0x14   : > { %p684_p2 = pnand %p2936_p0, %p683_p1 }
  0x15   : > { %p774_p3 = scmp.lt.s32.totalorder (!%p684_p2), %s3626_s28, 1  ;;  %s4440_s18 = sld [smem:[#allocation20_spill]] (!%p684_p2) }
  0x16   : > { %687 = sbr.rel (%p684_p2) target bundleno = 2927 (0xb6f), region = 100  ;;  %s4441_s19 = sld [smem:[#allocation21_spill]] (!%p684_p2) }
  0x17   : > { %s4442_s25 = sld [smem:[#allocation16_spill]] (!%p684_p2)  ;;  %p2946_p4 = scmp.ne.s32.totalorder (!%p684_p2), %s3626_s28, 0 }
  0x18   : > { %s4443_s30 = sld [smem:[#allocation14_spill]] (!%p684_p2) }
  0x19   : > { %s4444_s0 = sld [smem:[#allocation15_spill]] (!%p684_p2) }
  0x1b   : > { %v3634_v0 = vld [vmem:[%s4440_s18] sm:$0xff]  ;;  %s3662_s27 = scalar_select %p774_p3, %s3626_s28, 1 }
  0x1c   : > { %v3639_v1 = vld [vmem:[%s4441_s19] sm:$0xff]  ;;  %v3644_v2 = vld [vmem:[%s4441_s19 + $0x8] sm:$0xff]  ;;  %v3649_v3 = vld [vmem:[%s4441_s19 + $0x10] sm:$0xff]  ;;  %s4446_s3 = sld [smem:[#allocation12_spill]] (!%p2946_p4) }
  0x1d   : > { %v3654_v4 = vld [vmem:[%s4441_s19 + $0x18] sm:$0xff]  ;;  %v3659_v5 = vld [vmem:[%s4441_s19 + $0x20] sm:$0xff]  ;;  %v3667_v6 = vld [vmem:[%s4441_s19 + $0x28] sm:$0xff]  ;;  %s3205_s5 = sshll.u32 %s3662_s27, 4  ;;  %s786_s26 = scalar_lea.vmem %s4442_s25, %s3662_s27 }
  0x1e   : > { %v3672_v7 = vld [vmem:[%s4441_s19 + $0x30] sm:$0xff]  ;;  %v3677_v8 = vld [vmem:[%s4441_s19 + $0x38] sm:$0xff]  ;;  %s3687_s18 = scalar_lea.vmem %s4443_s30, %s3205_s5  ;;  %s3207_s19 = sshll.u32 %s3662_s27, 6 }
  0x1f   : > { %s3692_s22 = scalar_lea.vmem %s4444_s0, %s3205_s5  ;;  %s3702_s24 = scalar_lea.vmem %s4406_s7, %s3207_s19 }
  0x20   : > { %s2943_s6 = sshll.u32 %s3662_s27, 2  ;;  %s3208_s30 = sshll.u32 %s3662_s27, 8 }
  0x21   : > { %s3708_s29 = scalar_lea.vmem %s4407_s8, %s2943_s6  ;;  %s3714_s4 = scalar_lea.vmem %s4408_s9, %s3208_s30 }
  0x22   : > { %s809_s17 = scalar_lea.vmem %s4410_s11, %s3662_s27  ;;  %s812_s25 = scalar_lea.vmem %s4411_s12, %s3662_s27 }
  0x23   : > { %826 = sbr.rel (%p2946_p4) target bundleno = 182 (0xb6), region = 104  ;;  %s4447_s20 = sld [smem:[#allocation11_spill]] (!%p2946_p4) }
  0x24   : > { %s4448_s15 = sld [smem:[#allocation13_spill]] (!%p2946_p4) }
  0x28   : > { %v830_v9 = vld [vmem:[%s4446_s3] sm:$0x3]  ;;  %vm839_vm0 = vcmask 1041408   ;;  %vm835_vm1 = vcmask 31744   ;;  %vm857_vm2 = vcmask 261120  }
  0x29   : > { %v827_v10 = vld [vmem:[%s4447_s20] sm:$0xff]  ;;  %v828_v11 = vld [vmem:[%s4447_s20 + $0x8] sm:$0xff]  ;;  %v841_v12 = vsel %vm839_vm0, %v830_v9, 0 }
  0x2a   : > { %v829_v13 = vpack.c.bf16 %v828_v11, %v827_v10  ;;  %850 = vmatpush.bf16.msra.mxu0 %v841_v12  ;;  %v3299_v14 = vld [vmem:[%s4448_s15] ss:$0 sm:$0xff] }
  0x2d   : > { %2947 = vmatmul.msk.bf16.vlgmr.msra.gmra.mxu0 %vm835_vm1, %v829_v13 }
  0xaa   : > { %v852_v15 = vpop.f32.mrf.mxu0 }
  0xab   : > { %v853_v16 = vadd.f32 %v3299_v14, %v852_v15 }
  0xad   : > { %858 = vst.msk [vmem:[#allocation2] sm:$0xff] %vm857_vm2, %v853_v16 }
  0xb2   : > { %v854_v17 = vpop.f32.mrf.mxu0 }
  0xb3   : > { %v855_v18 = vadd.f32 %v3299_v14, %v854_v17 }
  0xb5   : > { %859 = vst.msk [vmem:[#allocation2 + $0x8] sm:$0xff] %vm857_vm2, %v855_v18 }
  0xb6 PF: > { %v3210_v19 = vld [vmem:[%s3687_s18 + $0x8] sm:$0xff]  ;;  %v3209_v20 = vld [vmem:[%s3687_s18] sm:$0xff]  ;;  %vm879_vm3 = vcmask 261120   ;;  %s3495_s0 = smov 96   ;;  %v900_v32 = vrot.slane %v3634_v0, 1  ;;  %v907_v33 = vperm.slane %v3634_v0, 0 }
  0xb7   : > { %v860_v21 = vld [vmem:[#allocation2] sm:$0xff]  ;;  %889 = vmatpush.bf16.msra.mxu0 %v3210_v19  ;;  %v901_v41 = vrot.slane %v3634_v0, 2  ;;  %v902_v42 = vrot.slane %v3634_v0, 3  ;;  %v903_v61 = vrot.slane %v3634_v0, 4  ;;  %v904_v62 = vrot.slane %v3634_v0, 5  ;;  %s3496_s18 = smov 64  }
  0xb8   : > { %v908_v34 = vperm.slane %v900_v32, 0  ;;  %vm1109_vm4 = vcmask 64512   ;;  %s4466_s3 = sld [smem:[#allocation17_spill]]  ;;  %p3146_p5 = scmp.ne.s32.totalorder %s3626_s28, 1 }
  0xb9   : > { %v909_v47 = vperm.slane %v901_v41, 0  ;;  %v910_v51 = vperm.slane %v902_v42, 0  ;;  %v911_v12 = vperm.slane %v903_v61, 0  ;;  %v912_v16 = vperm.slane %v904_v62, 0  ;;  %s4469_s1 = sld [smem:[#allocation18_spill]] (!%p3146_p5)  ;;  %s3498_s23 = smov (!%p3146_p5), 96  }
  0xbb   : > { %890 = vmatpush.bf16.msra.mxu0 %v3209_v20 }
  0xbc   : > { %v861_v22 = vld [vmem:[#allocation2 + $0x8] sm:$0xff] }
  0xbd   : > { %v862_v23 = vpack.c.bf16 %v861_v22, %v860_v21 }
  0xbe   : > { %s4467_s30 = scalar_lea.vmem %s4466_s3, %s3662_s27 }
  0xbf   : > { %2956 = vmatmul.msk.bf16.vlgmr.msra.gmra.mxu0 %vm879_vm3, %v862_v23 }
 0x13c   : > { %v3744_v24 = vpop.f32.mrf.mxu0 }
 0x13d   : > { %v897_v25 = vpack.c.bf16 %v3744_v24, %v3744_v24  ;;  %v923_v35 = vmul.f32 %v907_v33, %v3744_v24  ;;  %v924_v36 = vmul.f32 %v908_v34, %v3744_v24  ;;  %v925_v56 = vmul.f32 %v909_v47, %v3744_v24 }
 0x13e   : > { %v926_v57 = vmul.f32 %v910_v51, %v3744_v24  ;;  %v927_v19 = vmul.f32 %v911_v12, %v3744_v24  ;;  %v928_v20 = vmul.f32 %v912_v16, %v3744_v24 }
 0x13f   : > { %v976_v26 = vunpack.c.l.b16 %v897_v25  ;;  %v939_v37 = vpack.c.bf16 %v923_v35, %v923_v35  ;;  %v940_v38 = vpack.c.bf16 %v924_v36, %v924_v36  ;;  %v941_v59 = vpack.c.bf16 %v925_v56, %v925_v56 }
 0x140   : > { %v942_v60 = vpack.c.bf16 %v926_v57, %v926_v57  ;;  %v943_v22 = vpack.c.bf16 %v927_v19, %v927_v19  ;;  %v944_v23 = vpack.c.bf16 %v928_v20, %v928_v20  ;;  %v905_v25 = vrot.slane %v3634_v0, 6 }
 0x141   : > { %v3748_v27 = vpack.c.b16 %v976_v26, %v976_v26  ;;  %v963_v43 = vunpack.c.l.b16 %v939_v37  ;;  %v964_v44 = vunpack.c.l.b16 %v940_v38  ;;  %v965_v63 = vunpack.c.l.b16 %v941_v59 }
 0x142   : > { %v966_v9 = vunpack.c.l.b16 %v942_v60  ;;  %v906_v26 = vrot.slane %v3634_v0, 7 }
 0x143   : > { %978 = vrot.lane.b32.xlu0 %v3748_v27, %s3495_s0  ;;  %v971_v48 = vpack.c.b16 %v964_v44, %v963_v43 }
 0x144   : > { %v3751_v28 = vpop.f32.mrf.mxu0  ;;  %v972_v13 = vpack.c.b16 %v966_v9, %v965_v63  ;;  %v914_v38 = vperm.slane %v906_v26, 0 }
 0x145   : > { %v898_v29 = vpack.c.bf16 %v3751_v28, %v3751_v28  ;;  %v931_v45 = vmul.f32 %v907_v33, %v3751_v28  ;;  %v932_v46 = vmul.f32 %v908_v34, %v3751_v28  ;;  %v933_v10 = vmul.f32 %v909_v47, %v3751_v28 }
 0x146   : > { %v934_v11 = vmul.f32 %v910_v51, %v3751_v28  ;;  %v935_v32 = vmul.f32 %v911_v12, %v3751_v28  ;;  %v936_v33 = vmul.f32 %v912_v16, %v3751_v28  ;;  %v913_v34 = vperm.slane %v905_v25, 0 }
 0x147   : > { %v1045_v30 = vunpack.c.l.b16 %v898_v29  ;;  %v947_v49 = vpack.c.bf16 %v931_v45, %v931_v45  ;;  %v948_v50 = vpack.c.bf16 %v932_v46, %v932_v46  ;;  %v949_v14 = vpack.c.bf16 %v933_v10, %v933_v10 }
 0x148   : > { %v950_v15 = vpack.c.bf16 %v934_v11, %v934_v11  ;;  %v967_v29 = vunpack.c.l.b16 %v943_v22  ;;  %v951_v36 = vpack.c.bf16 %v935_v32, %v935_v32  ;;  %v952_v37 = vpack.c.bf16 %v936_v33, %v936_v33 }
 0x149   : > { %v3755_v31 = vpack.c.b16 %v1045_v30, %v1045_v30  ;;  %v1032_v54 = vunpack.c.l.b16 %v947_v49  ;;  %v1033_v55 = vunpack.c.l.b16 %v948_v50  ;;  %v1034_v17 = vunpack.c.l.b16 %v949_v14 }
 0x14a   : > { %v1035_v18 = vunpack.c.l.b16 %v950_v15  ;;  %v968_v30 = vunpack.c.l.b16 %v944_v23  ;;  %v929_v41 = vmul.f32 %v913_v34, %v3744_v24  ;;  %v930_v42 = vmul.f32 %v914_v38, %v3744_v24 }
 0x14b   : > { %1047 = vrot.lane.b32.xlu0 %v3755_v31, %s3495_s0  ;;  %v1040_v58 = vpack.c.b16 %v1033_v55, %v1032_v54  ;;  %v938_v49 = vmul.f32 %v914_v38, %v3751_v28 }
 0x14c   : > { %v1041_v21 = vpack.c.b16 %v1035_v18, %v1034_v17  ;;  %v973_v35 = vpack.c.b16 %v968_v30, %v967_v29  ;;  %v945_v44 = vpack.c.bf16 %v929_v41, %v929_v41  ;;  %v946_v45 = vpack.c.bf16 %v930_v42, %v930_v42 }
 0x14e   : > { %v969_v46 = vunpack.c.l.b16 %v945_v44  ;;  %v970_v47 = vunpack.c.l.b16 %v946_v45 }
 0x150   : > { %v974_v50 = vpack.c.b16 %v970_v47, %v969_v46 }
 0x1b5   : > { %v979_v39 = vpop.permute.xlu0 %978 }
 0x1b6   : > { %v993_v40 = vsel %vm879_vm3, %v979_v39, 0  ;;  %v1036_v39 = vunpack.c.l.b16 %v951_v36 }
 0x1b7   : > { %1002 = vmatpush.bf16.xpose.msra.mxu1 %v993_v40  ;;  %v1037_v40 = vunpack.c.l.b16 %v952_v37 }
 0x1b9   : > { %v1042_v43 = vpack.c.b16 %v1037_v40, %v1036_v39 }
 0x1bd   : > { %v1048_v52 = vpop.permute.xlu0 %1047 }
 0x1be   : > { %2957 = vmatmul.msk.bf16.vlgmr.msra.gmra.mxu1 %vm879_vm3, %v971_v48  ;;  %v1062_v53 = vsel %vm879_vm3, %v1048_v52, 0  ;;  %v937_v48 = vmul.f32 %v913_v34, %v3751_v28  ;;  %v954_v52 = vpack.c.bf16 %v938_v49, %v938_v49 }
 0x1bf   : > { %1071 = vmatpush.bf16.xpose.msra.mxu2 %v1062_v53 }
 0x1c0   : > { %v953_v51 = vpack.c.bf16 %v937_v48, %v937_v48  ;;  %v1039_v54 = vunpack.c.l.b16 %v954_v52 }
 0x1c2   : > { %v1038_v53 = vunpack.c.l.b16 %v953_v51 }
 0x1c4   : > { %v1043_v55 = vpack.c.b16 %v1039_v54, %v1038_v53 }
 0x1c6   : > { %2961 = vmatmul.msk.bf16.vlgmr.msra.gmra.mxu2 %vm879_vm3, %v1040_v58 }
 0x1ce   : > { %2958 = vmatmul.msk.bf16.gmra.mxu1 %vm879_vm3, %v972_v13 }
 0x1d6   : > { %2962 = vmatmul.msk.bf16.gmra.mxu2 %vm879_vm3, %v1041_v21 }
 0x1de   : > { %2959 = vmatmul.msk.bf16.gmra.mxu1 %vm879_vm3, %v973_v35 }
 0x1e6   : > { %2963 = vmatmul.msk.bf16.gmra.mxu2 %vm879_vm3, %v1042_v43 }
 0x1ee   : > { %2960 = vmatmul.msk.bf16.gmra.mxu1 %vm879_vm3, %v974_v50 }
 0x1f6   : > { %2964 = vmatmul.msk.bf16.gmra.mxu2 %vm879_vm3, %v1043_v55 }
 0x23b   : > { %v1004_v24 = vpop.f32.mrf.mxu1 }
 0x23c   : > { %v3792_v56 = vmul.f32 0.5, %v1004_v24 }
 0x23e   : > { %v1110_v57 = vsel %vm1109_vm4, %v3792_v56, -inf }
 0x23f   : > { %1111 = vmax.xlane.f32.xlu1 %v1110_v57 }
 0x243   : > { %v1006_v58 = vpop.f32.mrf.mxu1 }
 0x244   : > { %v3796_v28 = vmul.f32 0.5, %v1006_v58 }
 0x246   : > { %v1113_v59 = vsel %vm1109_vm4, %v3796_v28, -inf }
 0x247   : > { %1114 = vmax.xlane.f32.xlu1 %v1113_v59 }
 0x249   : > { %v1073_v60 = vpop.f32.mrf.mxu2 }
 0x24a   : > { %v3800_v61 = vmul.f32 0.5, %v1073_v60 }
 0x24b   : > { %v1009_v62 = vpop.f32.mrf.mxu1 }
 0x24c   : > { %v3802_v63 = vmul.f32 0.5, %v1009_v62  ;;  %v1134_v9 = vsel %vm1109_vm4, %v3800_v61, -inf }
 0x24d   : > { %1135 = vmax.xlane.f32.xlu2 %v1134_v9 }
 0x24e   : > { %v1116_v10 = vsel %vm1109_vm4, %v3802_v63, -inf }
 0x24f   : > { %1117 = vmax.xlane.f32.xlu0 %v1116_v10 }
 0x251   : > { %v1075_v11 = vpop.f32.mrf.mxu2 }
 0x252   : > { %v3808_v12 = vmul.f32 0.5, %v1075_v11 }
 0x253   : > { %v1011_v13 = vpop.f32.mrf.mxu1 }
 0x254   : > { %v3810_v14 = vmul.f32 0.5, %v1011_v13  ;;  %v1137_v15 = vsel %vm1109_vm4, %v3808_v12, -inf }
 0x255   : > { %1138 = vmax.xlane.f32.xlu2 %v1137_v15 }
 0x256   : > { %v1119_v16 = vsel %vm1109_vm4, %v3810_v14, -inf }
 0x257   : > { %1120 = vmax.xlane.f32.xlu1 %v1119_v16 }
 0x259   : > { %v1078_v17 = vpop.f32.mrf.mxu2 }
 0x25a   : > { %v3816_v18 = vmul.f32 0.5, %v1078_v17 }
 0x25b   : > { %v1014_v19 = vpop.f32.mrf.mxu1 }
 0x25c   : > { %v1140_v20 = vsel %vm1109_vm4, %v3816_v18, -inf  ;;  %v3820_v21 = vmul.f32 0.5, %v1014_v19 }
 0x25d   : > { %1141 = vmax.xlane.f32.xlu2 %v1140_v20 }
 0x25e   : > { %v1122_v26 = vsel %vm1109_vm4, %v3820_v21, -inf }
 0x261   : > { %v1080_v22 = vpop.f32.mrf.mxu2 }
 0x262   : > { %v3822_v23 = vmul.f32 0.5, %v1080_v22 }
 0x263   : > { %v1016_v25 = vpop.f32.mrf.mxu1 }
 0x264   : > { %v1143_v29 = vsel %vm1109_vm4, %v3822_v23, -inf  ;;  %v3828_v30 = vmul.f32 0.5, %v1016_v25 }
 0x265   : > { %1123 = vmax.xlane.f32.xlu2 %v1122_v26  ;;  %1144 = vmax.xlane.f32.xlu1 %v1143_v29 }
 0x266   : > { %v1125_v35 = vsel %vm1109_vm4, %v3828_v30, -inf }
 0x269   : > { %v1083_v32 = vpop.f32.mrf.mxu2 }
 0x26a   : > { %v3830_v33 = vmul.f32 0.5, %v1083_v32 }
 0x26b   : > { %v1019_v34 = vpop.f32.mrf.mxu1 }
 0x26c   : > { %v1146_v36 = vsel %vm1109_vm4, %v3830_v33, -inf  ;;  %v3836_v37 = vmul.f32 0.5, %v1019_v34 }
 0x26d   : > { %1126 = vmax.xlane.f32.xlu1 %v1125_v35  ;;  %1147 = vmax.xlane.f32.xlu2 %v1146_v36 }
 0x26e   : > { %v1128_v40 = vsel %vm1109_vm4, %v3836_v37, -inf }
 0x271   : > { %v1085_v38 = vpop.f32.mrf.mxu2 }
 0x272   : > { %v3838_v39 = vmul.f32 0.5, %v1085_v38 }
 0x273   : > { %v1021_v42 = vpop.f32.mrf.mxu1 }
 0x274   : > { %v1149_v41 = vsel %vm1109_vm4, %v3838_v39, -inf  ;;  %v3844_v43 = vmul.f32 0.5, %v1021_v42 }
 0x275   : > { %1129 = vmax.xlane.f32.xlu2 %v1128_v40  ;;  %1150 = vmax.xlane.f32.xlu1 %v1149_v41 }
 0x276   : > { %v1131_v46 = vsel %vm1109_vm4, %v3844_v43, -inf }
 0x279   : > { %v1088_v44 = vpop.f32.mrf.mxu2 }
 0x27a   : > { %v3846_v45 = vmul.f32 0.5, %v1088_v44 }
 0x27c   : > { %v1152_v47 = vsel %vm1109_vm4, %v3846_v45, -inf }
 0x27d   : > { %1132 = vmax.xlane.f32.xlu1 %v1131_v46  ;;  %1153 = vmax.xlane.f32.xlu2 %v1152_v47 }
 0x281   : > { %v1090_v48 = vpop.f32.mrf.mxu2 }
 0x282   : > { %v3852_v49 = vmul.f32 0.5, %v1090_v48 }
 0x284   : > { %v1155_v50 = vsel %vm1109_vm4, %v3852_v49, -inf }
 0x285   : > { %1156 = vmax.xlane.f32.xlu0 %v1155_v50 }
 0x2b2   : > { %v1112_v51 = vpop.xlane.xlu1 %1111 }
 0x2b3   : > { %v1158_v52 = vsub.f32 %v3792_v56, %v1112_v51 }
 0x2b5   : > { %v1174_v53 = vmul.f32 1.442695, %v1158_v52 }
 0x2b7   : > { %3305 = vpow2.f32 %v1174_v53 }
 0x2ba   : > { %v1115_v54 = vpop.xlane.xlu1 %1114 }
 0x2bb   : > { %v1159_v55 = vsub.f32 %v3796_v28, %v1115_v54 }
 0x2bd   : > { %v3858_v24 = vpop.eup %3305  ;;  %v1176_v57 = vmul.f32 1.442695, %v1159_v55 }
 0x2be   : > { %v1206_v58 = vsel %vm1109_vm4, %v3858_v24, 0.0 }
 0x2bf   : > { %3307 = vpow2.f32 %v1176_v57  ;;  %1207 = vadd.xlane.f32.xlu2 %v1206_v58 }
 0x2c0   : > { %v1136_v59 = vpop.xlane.xlu2 %1135 }
 0x2c1   : > { %v1166_v60 = vsub.f32 %v3800_v61, %v1136_v59 }
 0x2c2   : > { %v1118_v62 = vpop.xlane.xlu0 %1117 }
 0x2c3   : > { %v1190_v9 = vmul.f32 1.442695, %v1166_v60  ;;  %v1160_v56 = vsub.f32 %v3802_v63, %v1118_v62 }
 0x2c5   : > { %v3864_v10 = vpop.eup %3307  ;;  %3309 = vpow2.f32 %v1190_v9  ;;  %v1178_v11 = vmul.f32 1.442695, %v1160_v56 }
 0x2c6   : > { %v1209_v28 = vsel %vm1109_vm4, %v3864_v10, 0.0 }
 0x2c7   : > { %3311 = vpow2.f32 %v1178_v11  ;;  %1210 = vadd.xlane.f32.xlu1 %v1209_v28 }
 0x2c8   : > { %v1139_v13 = vpop.xlane.xlu2 %1138 }
 0x2c9   : > { %v1167_v15 = vsub.f32 %v3808_v12, %v1139_v13 }
 0x2ca   : > { %v1121_v16 = vpop.xlane.xlu1 %1120 }
 0x2cb   : > { %v3869_v17 = vpop.eup %3309  ;;  %v1192_v61 = vmul.f32 1.442695, %v1167_v15  ;;  %v1161_v19 = vsub.f32 %v3810_v14, %v1121_v16 }
 0x2cc   : > { %v1230_v22 = vsel %vm1109_vm4, %v3869_v17, 0.0 }
 0x2cd   : > { %v3872_v20 = vpop.eup %3311  ;;  %3313 = vpow2.f32 %v1192_v61  ;;  %v1180_v63 = vmul.f32 1.442695, %v1161_v19 }
 0x2ce   : > { %v1212_v25 = vsel %vm1109_vm4, %v3872_v20, 0.0 }
 0x2cf   : > { %3315 = vpow2.f32 %v1180_v63  ;;  %1231 = vadd.xlane.f32.xlu1 %v1230_v22  ;;  %1213 = vadd.xlane.f32.xlu0 %v1212_v25 }
 0x2d0   : > { %v1142_v12 = vpop.xlane.xlu2 %1141 }
 0x2d1   : > { %v1168_v26 = vsub.f32 %v3816_v18, %v1142_v12 }
 0x2d3   : > { %v3879_v29 = vpop.eup %3313  ;;  %v1194_v32 = vmul.f32 1.442695, %v1168_v26 }
 0x2d4   : > { %v1233_v14 = vsel %vm1109_vm4, %v3879_v29, 0.0 }
 0x2d5   : > { %v3883_v34 = vpop.eup %3315  ;;  %3317 = vpow2.f32 %v1194_v32  ;;  %1234 = vadd.xlane.f32.xlu2 %v1233_v14 }
 0x2d6   : > { %v1215_v35 = vsel %vm1109_vm4, %v3883_v34, 0.0 }
 0x2d7   : > { %1216 = vadd.xlane.f32.xlu1 %v1215_v35 }
 0x2d8   : > { %v1124_v36 = vpop.xlane.xlu2 %1123  ;;  %v1145_v38 = vpop.xlane.xlu1 %1144 }
 0x2d9   : > { %v1162_v40 = vsub.f32 %v3820_v21, %v1124_v36  ;;  %v1169_v42 = vsub.f32 %v3822_v23, %v1145_v38 }
 0x2db   : > { %v3888_v41 = vpop.eup %3317  ;;  %v1182_v18 = vmul.f32 1.442695, %v1162_v40  ;;  %v1196_v46 = vmul.f32 1.442695, %v1169_v42 }
 0x2dc   : > { %v1236_v44 = vsel %vm1109_vm4, %v3888_v41, 0.0 }
 0x2dd   : > { %3319 = vpow2.f32 %v1182_v18  ;;  %1237 = vadd.xlane.f32.xlu2 %v1236_v44 }
 0x2de   : > { %3321 = vpow2.f32 %v1196_v46 }
 0x2e0   : > { %v1127_v47 = vpop.xlane.xlu1 %1126  ;;  %v1148_v51 = vpop.xlane.xlu2 %1147 }
 0x2e1   : > { %v1163_v50 = vsub.f32 %v3828_v30, %v1127_v47  ;;  %v1170_v54 = vsub.f32 %v3830_v33, %v1148_v51 }
 0x2e3   : > { %v3893_v48 = vpop.eup %3319  ;;  %v1184_v52 = vmul.f32 1.442695, %v1163_v50  ;;  %v1198_v58 = vmul.f32 1.442695, %v1170_v54 }
 0x2e4   : > { %v1218_v21 = vsel %vm1109_vm4, %v3893_v48, 0.0  ;;  %v3898_v23 = vpop.eup %3321 }
 0x2e5   : > { %1219 = vadd.xlane.f32.xlu0 %v1218_v21  ;;  %3323 = vpow2.f32 %v1184_v52  ;;  %v1239_v55 = vsel %vm1109_vm4, %v3898_v23, 0.0 }
 0x2e6   : > { %3325 = vpow2.f32 %v1198_v58 }
 0x2e8   : > { %v1151_v53 = vpop.xlane.xlu1 %1150  ;;  %v1130_v57 = vpop.xlane.xlu2 %1129 }
 0x2e9   : > { %v1164_v61 = vsub.f32 %v3836_v37, %v1130_v57  ;;  %v1171_v63 = vsub.f32 %v3838_v39, %v1151_v53 }
 0x2eb   : > { %v3904_v59 = vpop.eup %3323  ;;  %v1200_v25 = vmul.f32 1.442695, %v1171_v63 }
 0x2ec   : > { %v1221_v62 = vsel %vm1109_vm4, %v3904_v59, 0.0  ;;  %v3910_v56 = vpop.eup %3325 }
 0x2ed   : > { %1240 = vadd.xlane.f32.xlu0 %v1239_v55 }
 0x2f0   : > { %1530 = vrot.lane.b32.xlu1 %v3748_v27, %s3496_s18  ;;  %v1133_v30 = vpop.xlane.xlu1 %1132  ;;  %v1154_v9 = vpop.xlane.xlu2 %1153  ;;  %v1242_v27 = vsel %vm1109_vm4, %v3910_v56, 0.0 }
 0x2f1   : > { %v1165_v60 = vsub.f32 %v3844_v43, %v1133_v30  ;;  %v1172_v11 = vsub.f32 %v3846_v45, %v1154_v9  ;;  %v1186_v45 = vmul.f32 1.442695, %v1164_v61 }
 0x2f3   : > { %v1188_v33 = vmul.f32 1.442695, %v1165_v60  ;;  %v1202_v28 = vmul.f32 1.442695, %v1172_v11 }
 0x2f5   : > { %1597 = vrot.lane.b32.xlu2 %v3755_v31, %s3496_s18  ;;  %1222 = vadd.xlane.f32.xlu0 %v1221_v62  ;;  %3327 = vpow2.f32 %v1188_v33 }
 0x2f6   : > { %3329 = vpow2.f32 %v1202_v28 }
 0x2f8   : > { %v1157_v13 = vpop.xlane.xlu0 %1156 }
 0x2f9   : > { %v1173_v15 = vsub.f32 %v3852_v49, %v1157_v13 }
 0x2fb   : > { %v3915_v43 = vpop.eup %3327  ;;  %v1204_v16 = vmul.f32 1.442695, %v1173_v15 }
 0x2fc   : > { %v1227_v31 = vsel %vm1109_vm4, %v3915_v43, 0.0  ;;  %v3921_v19 = vpop.eup %3329 }
 0x2fd   : > { %1243 = vadd.xlane.f32.xlu0 %v1242_v27  ;;  %3331 = vpow2.f32 %v1204_v16  ;;  %v1248_v22 = vsel %vm1109_vm4, %v3921_v19, 0.0 }
 0x2fe   : > { %3333 = vpow2.f32 %v1186_v45 }
 0x2ff   : > { %3335 = vpow2.f32 %v1200_v25 }
 0x303   : > { %v3926_v49 = vpop.eup %3331 }
 0x304   : > { %v1251_v12 = vsel %vm1109_vm4, %v3926_v49, 0.0  ;;  %v3930_v37 = vpop.eup %3333 }
 0x305   : > { %1228 = vadd.xlane.f32.xlu0 %v1227_v31  ;;  %v1224_v26 = vsel %vm1109_vm4, %v3930_v37, 0.0  ;;  %v3934_v32 = vpop.eup %3335 }
 0x306   : > { %v1245_v39 = vsel %vm1109_vm4, %v3934_v32, 0.0 }
 0x30d   : > { %1249 = vadd.xlane.f32.xlu0 %v1248_v22 }
 0x315   : > { %1252 = vadd.xlane.f32.xlu0 %v1251_v12 }
 0x31a   : > { %1225 = vadd.xlane.f32.xlu1 %v1224_v26 }
 0x31e   : > { %1246 = vadd.xlane.f32.xlu2 %v1245_v39 }
 0x332   : > { %v3938_v14 = vpop.xlane.xlu2 %1207 }
 0x333   : > { %vm1259_vm5 = vweird.f32 %v3938_v14  ;;  %v1263_v57 = vand.u32 2147483647, %v3938_v14  ;;  %v1265_v45 = vand.u32 2147483648, %v3938_v14 }
 0x335   : > { %vm1264_vm2 = vcmp.eq.f32.partialorder %v1263_v57, 8.507059e+37 }
 0x33a   : > { %v1211_v35 = vpop.xlane.xlu1 %1210 }
 0x33b   : > { %3337 = vrcp.f32 %v1211_v35  ;;  %v1280_v58 = vand.u32 2147483648, %v1211_v35  ;;  %vm1274_vm10 = vweird.f32 %v1211_v35  ;;  %v1278_v31 = vand.u32 2147483647, %v1211_v35 }
 0x33c   : > { %3339 = vrcp.f32 %v3938_v14 }
 0x33d   : > { %v1281_v22 = vor.u32 1.1754944e-38, %v1280_v58  ;;  %vm1279_vm0 = vcmp.eq.f32.partialorder %v1278_v31, 8.507059e+37 }
 0x341   : > { %v3941_v36 = vpop.eup %3337 }
 0x342   : > { %v3943_v38 = vpop.eup %3339  ;;  %v1232_v40 = vpop.xlane.xlu1 %1231  ;;  %v1270_v18 = vmul.f32 %v3941_v36, %v1211_v35  ;;  %vm1275_vm8 = vweird.f32 %v3941_v36 }
 0x343   : > { %3341 = vrcp.f32 %v1232_v40  ;;  %v1255_v42 = vmul.f32 %v3943_v38, %v3938_v14  ;;  %v3948_v46 = vpop.xlane.xlu0 %1213  ;;  %vm1260_vm7 = vweird.f32 %v3943_v38  ;;  %v1385_v33 = vand.u32 2147483648, %v1232_v40  ;;  %vm3981_vm12 = vmor %vm1274_vm10, %vm1275_vm8 }
 0x344   : > { %v1271_v44 = vsub.f32 1.0, %v1270_v18  ;;  %vm1379_vm9 = vweird.f32 %v1232_v40  ;;  %v1383_v11 = vand.u32 2147483647, %v1232_v40  ;;  %vm3997_vm13 = vmor %vm1259_vm5, %vm1260_vm7 }
 0x345   : > { %v1256_v51 = vsub.f32 1.0, %v1255_v42  ;;  %v1386_v26 = vor.u32 1.1754944e-38, %v1385_v33 }
 0x346   : > { %v1272_v53 = vmul.f32 %v3941_v36, %v1271_v44  ;;  %vm1384_vm14 = vcmp.eq.f32.partialorder %v1383_v11, 8.507059e+37 }
 0x347   : > { %v1257_v55 = vmul.f32 %v3943_v38, %v1256_v51 }
 0x348   : > { %v3950_v47 = vpop.xlane.xlu2 %1234  ;;  %v1273_v62 = vadd.f32 %v3941_v36, %v1272_v53 }
 0x349   : > { %v3342_v50 = vpop.eup %3341  ;;  %3343 = vrcp.f32 %v3950_v47  ;;  %v1258_v15 = vadd.f32 %v3943_v38, %v1257_v55  ;;  %v1400_v39 = vand.u32 2147483648, %v3950_v47  ;;  %v1398_v44 = vand.u32 2147483647, %v3950_v47 }
 0x34a   : > { %v1375_v21 = vmul.f32 %v3342_v50, %v1232_v40  ;;  %v3953_v52 = vpop.xlane.xlu1 %1216  ;;  %3345 = vrcp.f32 %v3948_v46  ;;  %vm1380_vm6 = vweird.f32 %v3342_v50  ;;  %v1277_v40 = vsel %vm3981_vm12, %v3941_v36, %v1273_v62 }
 0x34b   : > { %3347 = vrcp.f32 %v3953_v52  ;;  %vm3971_vm11 = vmor %vm1379_vm9, %vm1380_vm6  ;;  %v1262_v36 = vsel %vm3997_vm13, %v3943_v38, %v1258_v15  ;;  %vm1394_vm1 = vweird.f32 %v3950_v47  ;;  %v1282_v53 = vsel %vm1279_vm0, %v1281_v22, %v1277_v40 }
 0x34c   : > { %v1376_v54 = vsub.f32 1.0, %v1375_v21  ;;  %v1266_v21 = vor.u32 1.1754944e-38, %v1265_v45  ;;  %v1401_v55 = vor.u32 1.1754944e-38, %v1400_v39  ;;  %vm1544_vm6 = vcmask 1043456  }
 0x34d   : > { %vm1399_vm7 = vcmp.eq.f32.partialorder %v1398_v44, 8.507059e+37  ;;  %vm1304_vm10 = vweird.f32 %v3953_v52  ;;  %v1308_v40 = vand.u32 2147483647, %v3953_v52  ;;  %v1295_v44 = vand.u32 2147483648, %v3948_v46 }
 0x34e   : > { %v1377_v30 = vmul.f32 %v3342_v50, %v1376_v54  ;;  %v1267_v38 = vsel %vm1264_vm2, %v1266_v21, %v1262_v36 }
 0x34f   : > { %v3344_v60 = vpop.eup %3343  ;;  %v1268_v16 = vmul.f32 %v3858_v24, %v1267_v38  ;;  %v1310_v24 = vand.u32 2147483648, %v3953_v52 }
 0x350   : > { %v1378_v9 = vadd.f32 %v3342_v50, %v1377_v30  ;;  %v1390_v27 = vmul.f32 %v3344_v60, %v3950_v47  ;;  %v3965_v28 = vpop.xlane.xlu2 %1237  ;;  %v3967_v13 = vpop.eup %3345  ;;  %vm1395_vm15 = vweird.f32 %v3344_v60  ;;  %v1283_v47 = vmul.f32 %v3864_v10, %v1282_v53 }
 0x351   : > { %3349 = vrcp.f32 %v3965_v28  ;;  %v3976_v61 = vpop.eup %3347  ;;  %v1285_v51 = vmul.f32 %v3967_v13, %v3948_v46  ;;  %vm1396_vm5 = vmor %vm1394_vm1, %vm1395_vm15  ;;  %vm1290_vm9 = vweird.f32 %v3967_v13  ;;  %vm1409_vm1 = vweird.f32 %v3965_v28 }
 0x352   : > { %v1382_v25 = vsel %vm3971_vm11, %v3342_v50, %v1378_v9  ;;  %v1391_v12 = vsub.f32 1.0, %v1390_v27  ;;  %v1300_v35 = vmul.f32 %v3976_v61, %v3953_v52  ;;  %v1495_v22 = vpack.c.bf16 %v1283_v47, %v1283_v47 }
 0x353   : > { %v1387_v50 = vsel %vm1384_vm14, %v1386_v26, %v1382_v25  ;;  %v1286_v11 = vsub.f32 1.0, %v1285_v51  ;;  %vm1305_vm8 = vweird.f32 %v3976_v61  ;;  %v1494_v26 = vpack.c.bf16 %v1268_v16, %v1268_v16 }
 0x354   : > { %v1392_v42 = vmul.f32 %v3344_v60, %v1391_v12  ;;  %v1301_v58 = vsub.f32 1.0, %v1300_v35  ;;  %v1388_v9 = vmul.f32 %v3869_v17, %v1387_v50  ;;  %v1519_v18 = vunpack.c.l.b16 %v1495_v22  ;;  %vm4038_vm12 = vmor %vm1304_vm10, %vm1305_vm8 }
 0x355   : > { %v1287_v45 = vmul.f32 %v3967_v13, %v1286_v11  ;;  %vm1289_vm11 = vweird.f32 %v3948_v46  ;;  %v1293_v52 = vand.u32 2147483647, %v3948_v46  ;;  %v1518_v53 = vunpack.c.l.b16 %v1494_v26 }
 0x356   : > { %v1393_v14 = vadd.f32 %v3344_v60, %v1392_v42  ;;  %v1302_v31 = vmul.f32 %v3976_v61, %v1301_v58  ;;  %v1502_v17 = vpack.c.bf16 %v1388_v9, %v1388_v9  ;;  %vm4050_vm13 = vmor %vm1289_vm11, %vm1290_vm9  ;;  %vm1309_vm14 = vcmp.eq.f32.partialorder %v1308_v40, 8.507059e+37 }
 0x357   : > { %v4008_v54 = vpop.eup %3349  ;;  %v1288_v35 = vadd.f32 %v3967_v13, %v1287_v45  ;;  %vm1294_vm0 = vcmp.eq.f32.partialorder %v1293_v52, 8.507059e+37  ;;  %v1415_v47 = vand.u32 2147483648, %v3965_v28 }
 0x358   : > { %v1397_v30 = vsel %vm1396_vm5, %v3344_v60, %v1393_v14  ;;  %v1598_v62 = vpop.permute.xlu2 %1597  ;;  %v4010_v33 = vpop.xlane.xlu0 %1219  ;;  %v1405_v15 = vmul.f32 %v4008_v54, %v3965_v28  ;;  %v1303_v25 = vadd.f32 %v3976_v61, %v1302_v31  ;;  %v1585_v39 = vunpack.c.l.b16 %v1502_v17 }
 0x359   : > { %v1402_v27 = vsel %vm1399_vm7, %v1401_v55, %v1397_v30  ;;  %v1612_v57 = vsel %vm1544_vm6, %v1598_v62, 0  ;;  %3351 = vrcp.f32 %v4010_v33  ;;  %v1311_v30 = vor.u32 1.1754944e-38, %v1310_v24 }
 0x35a   : > { %1621 = vmatpush.bf16.msrb.mxu0 %v1612_v57  ;;  %v1403_v60 = vmul.f32 %v3879_v29, %v1402_v27  ;;  %v1406_v10 = vsub.f32 1.0, %v1405_v15  ;;  %v1307_v55 = vsel %vm4038_vm12, %v3976_v61, %v1303_v25  ;;  %v1526_v62 = vpack.c.b16 %v1519_v18, %v1518_v53 }
 0x35b   : > { %v1292_v9 = vsel %vm4050_vm13, %v3967_v13, %v1288_v35  ;;  %v1296_v61 = vor.u32 1.1754944e-38, %v1295_v44  ;;  %vm1410_vm15 = vweird.f32 %v4008_v54  ;;  %v1312_v11 = vsel %vm1309_vm14, %v1311_v30, %v1307_v55 }
 0x35c   : > { %v1503_v63 = vpack.c.bf16 %v1403_v60, %v1403_v60  ;;  %v1407_v51 = vmul.f32 %v4008_v54, %v1406_v10  ;;  %v1413_v15 = vand.u32 2147483647, %v3965_v28  ;;  %vm4067_vm2 = vmor %vm1409_vm1, %vm1410_vm15  ;;  %v1313_v17 = vmul.f32 %v3883_v34, %v1312_v11 }
 0x35d   : > { %v1297_v13 = vsel %vm1294_vm0, %v1296_v61, %v1292_v9  ;;  %v1416_v22 = vor.u32 1.1754944e-38, %v1415_v47  ;;  %vm1319_vm12 = vweird.f32 %v4010_v33 }
 0x35e   : > { %v1586_v12 = vunpack.c.l.b16 %v1503_v63  ;;  %v1408_v38 = vadd.f32 %v4008_v54, %v1407_v51  ;;  %v1298_v28 = vmul.f32 %v3872_v20, %v1297_v13  ;;  %vm1414_vm5 = vcmp.eq.f32.partialorder %v1413_v15, 8.507059e+37 }
 0x35f   : > { %v4032_v42 = vpop.eup %3351  ;;  %v1497_v24 = vpack.c.bf16 %v1313_v17, %v1313_v17 }
 0x360   : > { %v4027_v29 = vpop.xlane.xlu0 %1240  ;;  %v1593_v21 = vpack.c.b16 %v1586_v12, %v1585_v39  ;;  %v1315_v46 = vmul.f32 %v4032_v42, %v4010_v33  ;;  %v1412_v63 = vsel %vm4067_vm2, %v4008_v54, %v1408_v38  ;;  %v1496_v54 = vpack.c.bf16 %v1298_v28, %v1298_v28 }
 0x361   : > { %3353 = vrcp.f32 %v4027_v29  ;;  %v1430_v25 = vand.u32 2147483648, %v4027_v29  ;;  %v1428_v26 = vand.u32 2147483647, %v4027_v29  ;;  %v1417_v39 = vsel %vm1414_vm5, %v1416_v22, %v1412_v63 }
 0x362   : > { %v1531_v36 = vpop.permute.xlu1 %1530  ;;  %2969 = vmatmul.msk.bf16.vlgmr.msrb.gmra.mxu0 %vm1109_vm4, %v1593_v21  ;;  %v1316_v16 = vsub.f32 1.0, %v1315_v46  ;;  %vm1424_vm8 = vweird.f32 %v4027_v29  ;;  %v1418_v44 = vmul.f32 %v3888_v41, %v1417_v39  ;;  %vm1320_vm10 = vweird.f32 %v4032_v42 }
 0x363   : > { %v1546_v14 = vsel %vm1544_vm6, %v1531_v36, 0  ;;  %v1431_v40 = vor.u32 1.1754944e-38, %v1430_v25  ;;  %vm1429_vm11 = vcmp.eq.f32.partialorder %v1428_v26, 8.507059e+37  ;;  %v1521_v36 = vunpack.c.l.b16 %v1497_v24  ;;  %vm4089_vm13 = vmor %vm1319_vm12, %vm1320_vm10 }
 0x364   : > { %1555 = vmatpush.bf16.msra.mxu3 %v1546_v14  ;;  %v1317_v12 = vmul.f32 %v4032_v42, %v1316_v16  ;;  %v1325_v21 = vand.u32 2147483648, %v4010_v33  ;;  %v1323_v14 = vand.u32 2147483647, %v4010_v33  ;;  %v1520_v53 = vunpack.c.l.b16 %v1496_v54 }
 0x365   : > { %v1504_v46 = vpack.c.bf16 %v1418_v44, %v1418_v44 }
 0x366   : > { %v1318_v51 = vadd.f32 %v4032_v42, %v1317_v12  ;;  %v1527_v9 = vpack.c.b16 %v1521_v36, %v1520_v53  ;;  %v1326_v11 = vor.u32 1.1754944e-38, %v1325_v21  ;;  %vm1324_vm0 = vcmp.eq.f32.partialorder %v1323_v14, 8.507059e+37 }
 0x367   : > { %v3354_v27 = vpop.eup %3353  ;;  %2965 = vmatmul.msk.bf16.vlgmr.msra.gmra.mxu3 %vm1109_vm4, %v1526_v62  ;;  %v1587_v15 = vunpack.c.l.b16 %v1504_v46 }
 0x368   : > { %v1420_v57 = vmul.f32 %v3354_v27, %v4027_v29  ;;  %v1223_v31 = vpop.xlane.xlu0 %1222  ;;  %vm1425_vm7 = vweird.f32 %v3354_v27  ;;  %v1322_v38 = vsel %vm4089_vm13, %v4032_v42, %v1318_v51 }
 0x369   : > { %3355 = vrcp.f32 %v1223_v31  ;;  %vm1426_vm9 = vmor %vm1424_vm8, %vm1425_vm7  ;;  %v1340_v30 = vand.u32 2147483648, %v1223_v31  ;;  %v1338_v62 = vand.u32 2147483647, %v1223_v31  ;;  %vm1334_vm15 = vweird.f32 %v1223_v31 }
 0x36a   : > { %v1421_v45 = vsub.f32 1.0, %v1420_v57  ;;  %v1327_v57 = vsel %vm1324_vm0, %v1326_v11, %v1322_v38 }
 0x36b   : > { %vm1339_vm2 = vcmp.eq.f32.partialorder %v1338_v62, 8.507059e+37  ;;  %v1328_v17 = vmul.f32 %v3893_v48, %v1327_v57 }
 0x36c   : > { %v1422_v10 = vmul.f32 %v3354_v27, %v1421_v45 }
 0x36d   : > { %v1498_v45 = vpack.c.bf16 %v1328_v17, %v1328_v17 }
 0x36e   : > { %v1423_v34 = vadd.f32 %v3354_v27, %v1422_v10 }
 0x36f   : > { %v3356_v35 = vpop.eup %3355  ;;  %v1522_v10 = vunpack.c.l.b16 %v1498_v45 }
 0x370   : > { %v1330_v18 = vmul.f32 %v3356_v35, %v1223_v31  ;;  %v4080_v20 = vpop.xlane.xlu0 %1243  ;;  %v1427_v50 = vsel %vm1426_vm9, %v3354_v27, %v1423_v34  ;;  %vm1335_vm14 = vweird.f32 %v3356_v35  ;;  %v1341_v27 = vor.u32 1.1754944e-38, %v1340_v30 }
 0x371   : > { %v1432_v29 = vsel %vm1429_vm11, %v1431_v40, %v1427_v50  ;;  %vm1336_vm1 = vmor %vm1334_vm15, %vm1335_vm14  ;;  %vm1439_vm10 = vweird.f32 %v4080_v20  ;;  %v1443_v53 = vand.u32 2147483647, %v4080_v20 }
 0x372   : > { %v1331_v52 = vsub.f32 1.0, %v1330_v18  ;;  %v1433_v55 = vmul.f32 %v3898_v23, %v1432_v29 }
 0x373   : > { %vm1444_vm13 = vcmp.eq.f32.partialorder %v1443_v53, 8.507059e+37 }
 0x374   : > { %v1332_v58 = vmul.f32 %v3356_v35, %v1331_v52  ;;  %v1505_v61 = vpack.c.bf16 %v1433_v55, %v1433_v55  ;;  %v1445_v52 = vand.u32 2147483648, %v4080_v20 }
 0x376   : > { %v1333_v33 = vadd.f32 %v3356_v35, %v1332_v58  ;;  %v1588_v23 = vunpack.c.l.b16 %v1505_v61  ;;  %v1446_v38 = vor.u32 1.1754944e-38, %v1445_v52 }
 0x377   : > { %2966 = vmatmul.msk.bf16.gmra.mxu3 %vm1109_vm4, %v1527_v9 }
 0x378   : > { %v1229_v47 = vpop.xlane.xlu0 %1228  ;;  %v1337_v13 = vsel %vm1336_vm1, %v3356_v35, %v1333_v33  ;;  %v1594_v60 = vpack.c.b16 %v1588_v23, %v1587_v15 }
 0x379   : > { %v1342_v16 = vsel %vm1339_vm2, %v1341_v27, %v1337_v13  ;;  %3357 = vrcp.f32 %v1229_v47  ;;  %v1370_v18 = vand.u32 2147483648, %v1229_v47  ;;  %vm1364_vm7 = vweird.f32 %v1229_v47 }
 0x37a   : > { %v1343_v42 = vmul.f32 %v3904_v59, %v1342_v16  ;;  %2970 = vmatmul.msk.bf16.gmra.mxu0 %vm1109_vm4, %v1594_v60  ;;  %3359 = vrcp.f32 %v4080_v20  ;;  %v1368_v50 = vand.u32 2147483647, %v1229_v47 }
 0x37b   : > { %v1371_v55 = vor.u32 1.1754944e-38, %v1370_v18 }
 0x37c   : > { %v1499_v31 = vpack.c.bf16 %v1343_v42, %v1343_v42  ;;  %vm1369_vm12 = vcmp.eq.f32.partialorder %v1368_v50, 8.507059e+37 }
 0x37e   : > { %v1523_v28 = vunpack.c.l.b16 %v1499_v31 }
 0x37f   : > { %v3358_v22 = vpop.eup %3357 }
 0x380   : > { %v4101_v63 = vpop.xlane.xlu0 %1249  ;;  %v3360_v25 = vpop.eup %3359  ;;  %v1360_v12 = vmul.f32 %v3358_v22, %v1229_v47  ;;  %v1528_v26 = vpack.c.b16 %v1523_v28, %v1522_v10  ;;  %vm1365_vm5 = vweird.f32 %v3358_v22 }
 0x381   : > { %v1435_v24 = vmul.f32 %v3360_v25, %v4080_v20  ;;  %vm1440_vm8 = vweird.f32 %v3360_v25  ;;  %vm1366_vm9 = vmor %vm1364_vm7, %vm1365_vm5  ;;  %v1473_v53 = vand.u32 2147483647, %v4101_v63 }
 0x382   : > { %v1361_v48 = vsub.f32 1.0, %v1360_v12  ;;  %vm4116_vm11 = vmor %vm1439_vm10, %vm1440_vm8 }
 0x383   : > { %v1436_v39 = vsub.f32 1.0, %v1435_v24 }
 0x384   : > { %v1362_v34 = vmul.f32 %v3358_v22, %v1361_v48 }
 0x385   : > { %v1437_v54 = vmul.f32 %v3360_v25, %v1436_v39 }
 0x386   : > { %v1363_v40 = vadd.f32 %v3358_v22, %v1362_v34 }
 0x387   : > { %2967 = vmatmul.msk.bf16.gmra.mxu3 %vm1109_vm4, %v1528_v26  ;;  %v1438_v36 = vadd.f32 %v3360_v25, %v1437_v54 }
 0x388   : > { %v4105_v59 = vpop.xlane.xlu0 %1252  ;;  %v1367_v29 = vsel %vm1366_vm9, %v3358_v22, %v1363_v40 }
 0x389   : > { %3361 = vrcp.f32 %v4105_v59  ;;  %v1372_v62 = vsel %vm1369_vm12, %v1371_v55, %v1367_v29  ;;  %v1442_v9 = vsel %vm4116_vm11, %v3360_v25, %v1438_v36  ;;  %vm1484_vm11 = vweird.f32 %v4105_v59 }
 0x38a   : > { %v1373_v47 = vmul.f32 %v3915_v43, %v1372_v62  ;;  %v1447_v15 = vsel %vm1444_vm13, %v1446_v38, %v1442_v9  ;;  %v1488_v36 = vand.u32 2147483647, %v4105_v59  ;;  %vm1469_vm12 = vweird.f32 %v4101_v63 }
 0x38b   : > { %v1448_v25 = vmul.f32 %v3910_v56, %v1447_v15  ;;  %v1475_v29 = vand.u32 2147483648, %v4101_v63 }
 0x38c   : > { %v1501_v10 = vpack.c.bf16 %v1373_v47, %v1373_v47 }
 0x38d   : > { %v1226_v35 = vpop.xlane.xlu1 %1225  ;;  %v1506_v40 = vpack.c.bf16 %v1448_v25, %v1448_v25 }
 0x38e   : > { %3363 = vrcp.f32 %v1226_v35  ;;  %v1353_v11 = vand.u32 2147483647, %v1226_v35  ;;  %v1355_v33 = vand.u32 2147483648, %v1226_v35  ;;  %vm1349_vm15 = vweird.f32 %v1226_v35 }
 0x38f   : > { %3365 = vrcp.f32 %v4101_v63  ;;  %v4109_v51 = vpop.eup %3361  ;;  %v1589_v55 = vunpack.c.l.b16 %v1506_v40 }
 0x390   : > { %v1480_v30 = vmul.f32 %v4109_v51, %v4105_v59  ;;  %vm1354_vm1 = vcmp.eq.f32.partialorder %v1353_v11, 8.507059e+37  ;;  %v1356_v17 = vor.u32 1.1754944e-38, %v1355_v33  ;;  %vm1485_vm9 = vweird.f32 %v4109_v51 }
 0x391   : > { %v1247_v44 = vpop.xlane.xlu2 %1246  ;;  %vm1486_vm13 = vmor %vm1484_vm11, %vm1485_vm9 }
 0x392   : > { %3367 = vrcp.f32 %v1247_v44  ;;  %v1481_v57 = vsub.f32 1.0, %v1480_v30  ;;  %v1460_v42 = vand.u32 2147483648, %v1247_v44  ;;  %v1458_v22 = vand.u32 2147483647, %v1247_v44 }
 0x393   : > { %vm1454_vm5 = vweird.f32 %v1247_v44 }
 0x394   : > { %v3364_v21 = vpop.eup %3363  ;;  %v1482_v43 = vmul.f32 %v4109_v51, %v1481_v57  ;;  %v1461_v24 = vor.u32 1.1754944e-38, %v1460_v42  ;;  %vm1459_vm8 = vcmp.eq.f32.partialorder %v1458_v22, 8.507059e+37  ;;  %v3211_v57 = vld [vmem:[%s3692_s22] sm:$0xff] }
 0x395   : > { %v4112_v14 = vpop.eup %3365  ;;  %v1345_v41 = vmul.f32 %v3364_v21, %v1226_v35  ;;  %vm1350_vm14 = vweird.f32 %v3364_v21  ;;  %v1525_v35 = vunpack.c.l.b16 %v1501_v10 }
 0x396   : > { %v1465_v20 = vmul.f32 %v4112_v14, %v4101_v63  ;;  %vm1351_vm0 = vmor %vm1349_vm15, %vm1350_vm14  ;;  %v1483_v18 = vadd.f32 %v4109_v51, %v1482_v43  ;;  %vm1470_vm10 = vweird.f32 %v4112_v14  ;;  %vm1489_vm15 = vcmp.eq.f32.partialorder %v1488_v36, 8.507059e+37 }
 0x397   : > { %v1346_v46 = vsub.f32 1.0, %v1345_v41  ;;  %vm1471_vm14 = vmor %vm1469_vm12, %vm1470_vm10 }
 0x398   : > { %v3368_v61 = vpop.eup %3367  ;;  %v1466_v16 = vsub.f32 1.0, %v1465_v20 }
 0x399   : > { %v1347_v23 = vmul.f32 %v3364_v21, %v1346_v46  ;;  %v1450_v27 = vmul.f32 %v3368_v61, %v1247_v44  ;;  %vm1455_vm2 = vweird.f32 %v3368_v61  ;;  %v1476_v46 = vor.u32 1.1754944e-38, %v1475_v29 }
 0x39a   : > { %vm1456_vm7 = vmor %vm1454_vm5, %vm1455_vm2  ;;  %v1467_v48 = vmul.f32 %v4112_v14, %v1466_v16 }
 0x39b   : > { %v1348_v13 = vadd.f32 %v3364_v21, %v1347_v23  ;;  %v1451_v60 = vsub.f32 1.0, %v1450_v27 }
 0x39c   : > { %v1468_v44 = vadd.f32 %v4112_v14, %v1467_v48 }
 0x39d   : > { %v1352_v31 = vsel %vm1351_vm0, %v3364_v21, %v1348_v13  ;;  %v1452_v45 = vmul.f32 %v3368_v61, %v1451_v60  ;;  %vm1474_vm0 = vcmp.eq.f32.partialorder %v1473_v53, 8.507059e+37 }
 0x39e   : > { %v1357_v28 = vsel %vm1354_vm1, %v1356_v17, %v1352_v31  ;;  %v1472_v30 = vsel %vm1471_vm14, %v4112_v14, %v1468_v44  ;;  %v3212_v14 = vld [vmem:[%s3692_s22 + $0x8] sm:$0xff]  ;;  %v3217_v31 = vld [vmem:[%s3702_s24 + $0x24] sm:$0xf] }
 0x39f   : > { %v1453_v12 = vadd.f32 %v3368_v61, %v1452_v45  ;;  %v1358_v26 = vmul.f32 %v3930_v37, %v1357_v28  ;;  %v1490_v37 = vand.u32 2147483648, %v4105_v59  ;;  %v1477_v63 = vsel %vm1474_vm0, %v1476_v46, %v1472_v30  ;;  %1715 = vmatpush.bf16.msrb.mxu3 %v3212_v14  ;;  %v3002_v45 = vld [vmem:[%s3702_s24 + $0x30] sm:$0xf0] }
 0x3a0   : > { %v1478_v9 = vmul.f32 %v3921_v19, %v1477_v63  ;;  %v3005_v22 = vor.u32 %v3217_v31, %v3002_v45 }
 0x3a1   : > { %v1457_v39 = vsel %vm1456_vm7, %v3368_v61, %v1453_v12  ;;  %v1500_v34 = vpack.c.bf16 %v1358_v26, %v1358_v26  ;;  %v1491_v58 = vor.u32 1.1754944e-38, %v1490_v37 }
 0x3a2   : > { %v1462_v54 = vsel %vm1459_vm8, %v1461_v24, %v1457_v39  ;;  %v1508_v38 = vpack.c.bf16 %v1478_v9, %v1478_v9  ;;  %1859 = vmatpush.bf16.msrb.mxu2 %v3005_v22 }
 0x3a3   : > { %v1524_v56 = vunpack.c.l.b16 %v1500_v34  ;;  %v1463_v50 = vmul.f32 %v3934_v32, %v1462_v54  ;;  %v1487_v32 = vsel %vm1486_vm13, %v4109_v51, %v1483_v18  ;;  %1716 = vmatpush.bf16.msrb.mxu3 %v3211_v57 }
 0x3a4   : > { %v1492_v62 = vsel %vm1489_vm15, %v1491_v58, %v1487_v32  ;;  %v1591_v11 = vunpack.c.l.b16 %v1508_v38 }
 0x3a5   : > { %v1529_v21 = vpack.c.b16 %v1525_v35, %v1524_v56  ;;  %v1507_v52 = vpack.c.bf16 %v1463_v50, %v1463_v50  ;;  %v1493_v51 = vmul.f32 %v3926_v49, %v1492_v62 }
 0x3a7   : > { %2968 = vmatmul.msk.bf16.gmra.mxu3 %vm1109_vm4, %v1529_v21  ;;  %v1590_v41 = vunpack.c.l.b16 %v1507_v52  ;;  %v1509_v61 = vpack.c.bf16 %v1493_v51, %v1493_v51 }
 0x3a9   : > { %v1595_v59 = vpack.c.b16 %v1590_v41, %v1589_v55  ;;  %v1592_v20 = vunpack.c.l.b16 %v1509_v61 }
 0x3ab   : > { %2971 = vmatmul.msk.bf16.gmra.mxu0 %vm1109_vm4, %v1595_v59  ;;  %v1596_v33 = vpack.c.b16 %v1592_v20, %v1591_v11 }
 0x3bb   : > { %2972 = vmatmul.msk.bf16.gmra.mxu0 %vm1109_vm4, %v1596_v33 }
 0x3df   : > { %v1623_v47 = vpop.f32.mrf.mxu0 }
 0x3e0   : > { %v1651_v12 = vmul.f32 %v1623_v47, %v3639_v1 }
 0x3e2   : > { %v1674_v40 = vsel %vm879_vm3, %v1651_v12, 0.0 }
 0x3e7   : > { %v1625_v13 = vpop.f32.mrf.mxu0 }
 0x3e8   : > { %v1652_v25 = vmul.f32 %v1625_v13, %v3644_v2 }
 0x3ea   : > { %v1557_v23 = vpop.f32.mrf.mxu3  ;;  %v1675_v39 = vsel %vm879_vm3, %v1652_v25, 0.0 }
 0x3eb   : > { %v1643_v26 = vmul.f32 %v1557_v23, %v3639_v1  ;;  %v1676_v50 = vadd.f32 %v1675_v39, %v1674_v40 }
 0x3f2   : > { %v1559_v27 = vpop.f32.mrf.mxu3 }
 0x3f3   : > { %v1644_v43 = vmul.f32 %v1559_v27, %v3644_v2  ;;  %v1659_v2 = vsel %vm879_vm3, %v1643_v26, 0.0 }
 0x3f5   : > { %v1660_v34 = vsel %vm879_vm3, %v1644_v43, 0.0 }
 0x3f6   : > { %v1661_v37 = vadd.f32 %v1660_v34, %v1659_v2 }
 0x3f7   : > { %v1628_v19 = vpop.f32.mrf.mxu0 }
 0x3f8   : > { %v1653_v24 = vmul.f32 %v1628_v19, %v3649_v3 }
 0x3fa   : > { %v1562_v15 = vpop.f32.mrf.mxu3  ;;  %v1677_v18 = vsel %vm879_vm3, %v1653_v24, 0.0 }
 0x3fb   : > { %v1645_v48 = vmul.f32 %v1562_v15, %v3649_v3  ;;  %v1678_v29 = vadd.f32 %v1677_v18, %v1676_v50  ;;  %v3000_v18 = vld [vmem:[%s3702_s24 + $0x20] sm:$0xf]  ;;  %v3010_v50 = vld [vmem:[%s3702_s24 + $0x38] sm:$0xf0] }
 0x3fd   : > { %v1662_v1 = vsel %vm879_vm3, %v1645_v48, 0.0 }
 0x3fe   : > { %v1663_v53 = vadd.f32 %v1662_v1, %v1661_v37  ;;  %v3219_v1 = vld [vmem:[%s3702_s24 + $0x2c] sm:$0xf0]  ;;  %v3213_v37 = vld [vmem:[%s3702_s24 + $0x4] sm:$0xf] }
 0x3ff   : > { %v1630_v16 = vpop.f32.mrf.mxu0 }
 0x400   : > { %v1654_v35 = vmul.f32 %v1630_v16, %v3654_v4 }
 0x402   : > { %v1564_v49 = vpop.f32.mrf.mxu3  ;;  %v1679_v36 = vsel %vm879_vm3, %v1654_v35, 0.0 }
 0x403   : > { %v1646_v54 = vmul.f32 %v1564_v49, %v3654_v4  ;;  %v1680_v59 = vadd.f32 %v1679_v36, %v1678_v29  ;;  %v3373_v49 = vld [vmem:[#allocation2] sm:$0xff] }
 0x405   : > { %v1664_v21 = vsel %vm879_vm3, %v1646_v54, 0.0 }
 0x406   : > { %v1665_v30 = vadd.f32 %v1664_v21, %v1663_v53  ;;  %v3215_v53 = vld [vmem:[%s3702_s24 + $0xc] sm:$0xf0] }
 0x40a   : > { %v1567_v60 = vpop.f32.mrf.mxu3 }
 0x40b   : > { %v1647_v56 = vmul.f32 %v1567_v60, %v3659_v5 }
 0x40d   : > { %v1666_v55 = vsel %vm879_vm3, %v1647_v56, 0.0  ;;  %v3001_v56 = vor.u32 %v3219_v1, %v3000_v18  ;;  %v3241_v18 = vld [vmem:[%s3714_s4 + $0xa0] sm:$0xff]  ;;  %v3223_v1 = vld [vmem:[%s3714_s4 + $0x10] sm:$0xff] }
 0x40f   : > { %1845 = vmatpush.bf16.msrb.mxu1 %v3001_v56  ;;  %v3247_v56 = vld [vmem:[%s3714_s4 + $0xd0] sm:$0xff] }
 0x412   : > { %v1569_v17 = vpop.f32.mrf.mxu3 }
 0x413   : > { %v1648_v4 = vmul.f32 %v1569_v17, %v3667_v6  ;;  %v3374_v17 = vld [vmem:[#allocation2 + $0x8] sm:$0xff] }
 0x415   : > { %v1668_v46 = vsel %vm879_vm3, %v1648_v4, 0.0  ;;  %v2986_v4 = vld [vmem:[%s3702_s24 + $0x10] sm:$0xf0] }
 0x416   : > { %v2989_v29 = vor.u32 %v3213_v37, %v2986_v4  ;;  %v3222_v37 = vld [vmem:[%s3714_s4 + $0x8] sm:$0xff]  ;;  %v3221_v4 = vld [vmem:[%s3714_s4] sm:$0xff] }
 0x418   : > { %1860 = vmatpush.bf16.msrb.mxu2 %v2989_v29  ;;  %v3230_v29 = vld [vmem:[%s3714_s4 + $0x48] sm:$0xff] }
 0x428   : > { %v1633_v42 = vpop.f32.mrf.mxu0 }
 0x429   : > { %v1655_v3 = vmul.f32 %v1633_v42, %v3659_v5 }
 0x42a   : > { %v1572_v28 = vpop.f32.mrf.mxu3 }
 0x42b   : > { %v1681_v41 = vsel %vm879_vm3, %v1655_v3, 0.0  ;;  %v1649_v5 = vmul.f32 %v1572_v28, %v3672_v7  ;;  %v3218_v3 = vld [vmem:[%s3702_s24 + $0x2c] sm:$0xf] }
 0x42c   : > { %v1682_v51 = vadd.f32 %v1681_v41, %v1680_v59  ;;  %v3013_v21 = vor.u32 %v3218_v3, %v3010_v50  ;;  %v3220_v59 = vld [vmem:[%s3702_s24 + $0x34] sm:$0xf0] }
 0x42d   : > { %v1670_v9 = vsel %vm879_vm3, %v1649_v5, 0.0  ;;  %v3232_v3 = vld [vmem:[%s3714_s4 + $0x58] sm:$0xff] }
 0x42e   : > { %1887 = vmatpush.bf16.msra.mxu0 %v3013_v21  ;;  %v3240_v50 = vld [vmem:[%s3714_s4 + $0x98] sm:$0xff]  ;;  %v3239_v21 = vld [vmem:[%s3714_s4 + $0x90] sm:$0xff] }
 0x430   : > { %v1635_v10 = vpop.f32.mrf.mxu0 }
 0x431   : > { %v1656_v52 = vmul.f32 %v1635_v10, %v3667_v6  ;;  %v1667_v6 = vadd.f32 %v1666_v55, %v1665_v30  ;;  %v2994_v55 = vld [vmem:[%s3702_s24 + $0x18] sm:$0xf0] }
 0x432   : > { %v1574_v32 = vpop.f32.mrf.mxu3 }
 0x433   : > { %v1683_v62 = vsel %vm879_vm3, %v1656_v52, 0.0  ;;  %v1650_v63 = vmul.f32 %v1574_v32, %v3677_v8  ;;  %v1669_v38 = vadd.f32 %v1668_v46, %v1667_v6  ;;  %v2984_v52 = vld [vmem:[%s3702_s24] sm:$0xf]  ;;  %v3214_v32 = vld [vmem:[%s3702_s24 + $0xc] sm:$0xf] }
 0x434   : > { %v1684_v20 = vadd.f32 %v1683_v62, %v1682_v51  ;;  %v2985_v30 = vor.u32 %v3215_v53, %v2984_v52  ;;  %v2997_v46 = vor.u32 %v3214_v32, %v2994_v55  ;;  %v3216_v6 = vld [vmem:[%s3702_s24 + $0x14] sm:$0xf0]  ;;  %v3245_v52 = vld [vmem:[%s3714_s4 + $0xc0] sm:$0xff]  ;;  %v3238_v53 = vld [vmem:[%s3714_s4 + $0x88] sm:$0xff] }
 0x435   : > { %v1672_v33 = vsel %vm879_vm3, %v1650_v63, 0.0  ;;  %v1671_v14 = vadd.f32 %v1670_v9, %v1669_v38  ;;  %v2992_v63 = vld [vmem:[%s3702_s24 + $0x8] sm:$0xf]  ;;  %v3252_v38 = vld [vmem:[%s3714_s4 + $0xf8] sm:$0xff]  ;;  %v3229_v32 = vld [vmem:[%s3714_s4 + $0x40] sm:$0xff] }
 0x436   : > { %1846 = vmatpush.bf16.msrb.mxu1 %v2985_v30  ;;  %v2993_v9 = vor.u32 %v3216_v6, %v2992_v63  ;;  %1888 = vmatpush.bf16.msra.mxu0 %v2997_v46  ;;  %v3237_v55 = vld [vmem:[%s3714_s4 + $0x80] sm:$0xff] }
 0x437   : > { %v1673_v47 = vadd.f32 %v1672_v33, %v1671_v14  ;;  %v3244_v33 = vld [vmem:[%s3714_s4 + $0xb8] sm:$0xff]  ;;  %v3251_v14 = vld [vmem:[%s3714_s4 + $0xf0] sm:$0xff] }
 0x438   : > { %v1638_v44 = vpop.f32.mrf.mxu0 }
 0x439   : > { %v1657_v58 = vmul.f32 %v1638_v44, %v3672_v7 }
 0x43a   : > { %2205 = vmatpush.bf16.msrb.mxu0 %v3252_v38 }
 0x43b   : > { %v1685_v61 = vsel %vm879_vm3, %v1657_v58, 0.0  ;;  %v3008_v58 = vld [vmem:[%s3702_s24 + $0x28] sm:$0xf] }
 0x43c   : > { %v1686_v23 = vadd.f32 %v1685_v61, %v1684_v20  ;;  %v3009_v62 = vor.u32 %v3220_v59, %v3008_v58  ;;  %v3228_v61 = vld [vmem:[%s3714_s4 + $0x38] sm:$0xff] }
 0x43d   : > { %2163 = vmatpush.bf16.msra.mxu1 %v3228_v61 }
 0x43e   : > { %1873 = vmatpush.bf16.msra.mxu3 %v3009_v62  ;;  %2206 = vmatpush.bf16.msrb.mxu0 %v3251_v14 }
 0x440   : > { %v1640_v11 = vpop.f32.mrf.mxu0 }
 0x441   : > { %v1658_v7 = vmul.f32 %v1640_v11, %v3677_v8  ;;  %v3236_v11 = vld [vmem:[%s3714_s4 + $0x78] sm:$0xff] }
 0x442   : > { %2177 = vmatpush.bf16.msra.mxu2 %v3236_v11  ;;  %1874 = vmatpush.bf16.msra.mxu3 %v2993_v9 }
 0x443   : > { %v1687_v27 = vsel %vm879_vm3, %v1658_v7, 0.0  ;;  %v3227_v7 = vld [vmem:[%s3714_s4 + $0x30] sm:$0xff] }
 0x444   : > { %v1688_v15 = vadd.f32 %v1687_v27, %v1686_v23  ;;  %v3235_v27 = vld [vmem:[%s3714_s4 + $0x70] sm:$0xff]  ;;  %2164 = vmatpush.bf16.msra.mxu1 %v3227_v7 }
 0x446   : > { %v1689_v57 = vpack.c.bf16 %v1688_v15, %v1673_v47  ;;  %v3243_v47 = vld [vmem:[%s3714_s4 + $0xb0] sm:$0xff]  ;;  %v3226_v15 = vld [vmem:[%s3714_s4 + $0x28] sm:$0xff]  ;;  %2178 = vmatpush.bf16.msra.mxu2 %v3235_v27 }
 0x448   : > { %2981 = vmatmul.msk.bf16.vlgmr.msrb.gmra.mxu3 %vm879_vm3, %v1689_v57  ;;  %v3250_v57 = vld [vmem:[%s3714_s4 + $0xe8] sm:$0xff]  ;;  %2165 = vmatpush.bf16.msra.mxu1 %v3226_v15 }
 0x449   : > { %2191 = vmatpush.bf16.msrb.mxu3 %v3244_v33  ;;  %2207 = vmatpush.bf16.msrb.mxu0 %v3250_v57 }
 0x44d   : > { %2192 = vmatpush.bf16.msrb.mxu3 %v3243_v47 }
 0x4cb   : > { %v1718_v13 = vpop.f32.mrf.mxu3 }
 0x4cc   : > { %v4188_v19 = vadd.f32 %v3373_v49, %v1718_v13  ;;  %v3234_v13 = vld [vmem:[%s3714_s4 + $0x68] sm:$0xff] }
 0x4cd   : > { %v3242_v49 = vld [vmem:[%s3714_s4 + $0xa8] sm:$0xff]  ;;  %2179 = vmatpush.bf16.msra.mxu2 %v3234_v13 }
 0x4ce   : > { %v1736_v16 = vmul.f32 %v4188_v19, %v4188_v19  ;;  %v1727_v8 = vsel %vm879_vm3, %v4188_v19, 0.0  ;;  %2193 = vmatpush.bf16.msrb.mxu3 %v3242_v49 }
 0x4d0   : > { %v1738_v28 = vsel %vm879_vm3, %v1736_v16, 0.0  ;;  %v3249_v16 = vld [vmem:[%s3714_s4 + $0xe0] sm:$0xff] }
 0x4d1   : > { %2208 = vmatpush.bf16.msrb.mxu0 %v3249_v16 }
 0x4d2   : > { %2194 = vmatpush.bf16.msrb.mxu3 %v3241_v18 }
 0x4d3   : > { %v1720_v60 = vpop.f32.mrf.mxu3 }
 0x4d4   : > { %v4192_v42 = vadd.f32 %v3374_v17, %v1720_v60  ;;  %v3225_v60 = vld [vmem:[%s3714_s4 + $0x20] sm:$0xff] }
 0x4d5   : > { %2166 = vmatpush.bf16.msra.mxu1 %v3225_v60 }
 0x4d6   : > { %v1728_v31 = vsel %vm879_vm3, %v4192_v42, 0.0  ;;  %v1737_v45 = vmul.f32 %v4192_v42, %v4192_v42  ;;  %2195 = vmatpush.bf16.msrb.mxu3 %v3240_v50 }
 0x4d7   : > { %v1729_v22 = vadd.f32 %v1728_v31, %v1727_v8 }
 0x4d8   : > { %v1739_v10 = vsel %vm879_vm3, %v1737_v45, 0.0 }
 0x4d9   : > { %v1730_v25 = vrot.slane %v1729_v22, 4  ;;  %v1740_v43 = vadd.f32 %v1739_v10, %v1738_v28 }
 0x4da   : > { %2196 = vmatpush.bf16.msrb.mxu3 %v3239_v21 }
 0x4db   : > { %v1731_v12 = vadd.f32 %v1730_v25, %v1729_v22  ;;  %v1741_v26 = vrot.slane %v1740_v43, 4 }
 0x4dd   : > { %v1732_v24 = vrot.slane %v1731_v12, 2  ;;  %v1742_v48 = vadd.f32 %v1741_v26, %v1740_v43  ;;  %v3300_v43 = vld [vmem:[%s786_s26] ss:$0 sm:$0xff] }
 0x4de   : > { %2197 = vmatpush.bf16.msrb.mxu3 %v3238_v53 }
 0x4df   : > { %v1733_v39 = vadd.f32 %v1732_v24, %v1731_v12  ;;  %v1743_v34 = vrot.slane %v1742_v48, 2 }
 0x4e1   : > { %v1734_v35 = vrot.slane %v1733_v39, 1  ;;  %v1744_v54 = vadd.f32 %v1743_v34, %v1742_v48 }
 0x4e2   : > { %2198 = vmatpush.bf16.msrb.mxu3 %v3237_v55 }
 0x4e3   : > { %v1735_v40 = vadd.f32 %v1734_v35, %v1733_v39  ;;  %v1745_v2 = vrot.slane %v1744_v54, 1 }
 0x4e5   : > { %v1746_v44 = vadd.f32 %v1745_v2, %v1744_v54  ;;  %v4207_v36 = vmul.f32 0.0625, %v1735_v40  ;;  %v3224_v54 = vld [vmem:[%s3714_s4 + $0x18] sm:$0xff]  ;;  %v3233_v2 = vld [vmem:[%s3714_s4 + $0x60] sm:$0xff] }
 0x4e6   : > { %v3248_v40 = vld [vmem:[%s3714_s4 + $0xd8] sm:$0xff]  ;;  %2167 = vmatpush.bf16.msra.mxu1 %v3224_v54  ;;  %2180 = vmatpush.bf16.msra.mxu2 %v3233_v2 }
 0x4e7   : > { %v1748_v41 = vmul.f32 0.0625, %v1746_v44  ;;  %v1749_v5 = vmul.f32 %v4207_v36, %v4207_v36  ;;  %v1752_v10 = vsub.f32 %v4188_v19, %v4207_v36  ;;  %v1753_v25 = vsub.f32 %v4192_v42, %v4207_v36  ;;  %v3301_v19 = vld [vmem:[%s4467_s30] ss:$0 sm:$0xff]  ;;  %2209 = vmatpush.bf16.msrb.mxu0 %v3248_v40  ;;  %v3246_v44 = vld [vmem:[%s3714_s4 + $0xc8] sm:$0xff]  ;;  %v3231_v36 = vld [vmem:[%s3714_s4 + $0x50] sm:$0xff]  ;;  %s4468_s4 = scalar_lea.vmem %s4409_s10, %s3662_s27  ;;  %s4470_s27 = sld [smem:[#allocation19_spill]] (!%p3146_p5) }
 0x4e8   : > { %v3302_v54 = vld [vmem:[%s4468_s4] ss:$0 sm:$0xff] }
 0x4e9   : > { %v1750_v51 = vsub.f32 %v1748_v41, %v1749_v5  ;;  %v1786_v41 = vld [vmem:[%s3708_s29] sm:$0xf] }
 0x4ea   : > { %2168 = vmatpush.bf16.msra.mxu1 %v3223_v1  ;;  %2181 = vmatpush.bf16.msra.mxu2 %v3232_v3  ;;  %v1788_v59 = vperm.slane %v1786_v41, 0  ;;  %v1791_v30 = vperm.slane %v1786_v41, 3  ;;  %v1789_v9 = vperm.slane %v1786_v41, 1 }
 0x4eb   : > { %v1751_v20 = vmax.f32 %v1750_v51, 0.0  ;;  %2210 = vmatpush.bf16.msrb.mxu0 %v3247_v56 }
 0x4ed   : > { %v1754_v23 = vadd.f32 1e-05, %v1751_v20  ;;  %v1790_v20 = vperm.slane %v1786_v41, 2 }
 0x4ee   : > { %2169 = vmatpush.bf16.msra.mxu1 %v3222_v37  ;;  %2182 = vmatpush.bf16.msra.mxu2 %v3231_v36 }
 0x4ef   : > { %3369 = vrsqrt.f32 %v1754_v23  ;;  %vm1761_vm2 = vweird.f32 %v1754_v23  ;;  %2211 = vmatpush.bf16.msrb.mxu0 %v3246_v44 }
 0x4f2   : > { %2170 = vmatpush.bf16.msra.mxu1 %v3221_v4  ;;  %2183 = vmatpush.bf16.msra.mxu2 %v3230_v29 }
 0x4f3   : > { %2212 = vmatpush.bf16.msrb.mxu0 %v3245_v52 }
 0x4f5   : > { %v3370_v17 = vpop.eup %3369 }
 0x4f6   : > { %v1756_v8 = vmul.f32 %v3370_v17, %v1754_v23  ;;  %vm1762_vm1 = vweird.f32 %v3370_v17  ;;  %2184 = vmatpush.bf16.msra.mxu2 %v3229_v32 }
 0x4f7   : > { %vm1763_vm5 = vmor %vm1761_vm2, %vm1762_vm1 }
 0x4f8   : > { %v1757_v31 = vmul.f32 %v3370_v17, %v1756_v8 }
 0x4fa   : > { %v1758_v45 = vmul.f32 0.5, %v1757_v31 }
 0x4fc   : > { %v1759_v22 = vsub.f32 1.5, %v1758_v45 }
 0x4fe   : > { %v1760_v28 = vmul.f32 %v3370_v17, %v1759_v22 }
 0x500   : > { %v1764_v12 = vsel %vm1763_vm5, %v3370_v17, %v1760_v28 }
 0x501   : > { %v1765_v26 = vmul.f32 %v1764_v12, %v1752_v10  ;;  %v1766_v24 = vmul.f32 %v1764_v12, %v1753_v25 }
 0x503   : > { %v1770_v42 = vmul.f32 %v3300_v43, %v1765_v26  ;;  %v1771_v48 = vmul.f32 %v3300_v43, %v1766_v24 }
 0x505   : > { %v4248_v39 = vadd.f32 %v3301_v19, %v1770_v42  ;;  %v4250_v34 = vadd.f32 %v3301_v19, %v1771_v48 }
 0x507   : > { %v1777_v35 = vpack.c.bf16 %v4250_v34, %v4248_v39 }
 0x509   : > { %3014 = vmatmul.msk.bf16.vlgmr.msrb.gmra.mxu1 %vm879_vm3, %v1777_v35  ;;  %3015 = vmatmul.msk.bf16.vlgmr.msrb.gmra.mxu2 %vm879_vm3, %v1777_v35 }
 0x50a   : > { %3016 = vmatmul.msk.bf16.vlgmr.msra.gmra.mxu3 %vm879_vm3, %v1777_v35  ;;  %3017 = vmatmul.msk.bf16.vlgmr.msra.gmra.mxu0 %vm879_vm3, %v1777_v35 }
 0x586   : > { %v1848_v5 = vpop.f32.mrf.mxu1 }
 0x587   : > { %v1890_v58 = vpop.f32.mrf.mxu0  ;;  %v1849_v62 = vadd.f32 %v1848_v5, %v1788_v59 }
 0x588   : > { %v1891_v6 = vadd.f32 %v1890_v58, %v1791_v30 }
 0x589   : > { %v1895_v33 = vmax.f32 %v1849_v62, 0.0 }
 0x58a   : > { %v1898_v14 = vmax.f32 %v1891_v6, 0.0 }
 0x58c   : > { %v1862_v46 = vpop.f32.mrf.mxu2 }
 0x58d   : > { %v1876_v63 = vpop.f32.mrf.mxu3  ;;  %v1863_v27 = vadd.f32 %v1862_v46, %v1789_v9 }
 0x58e   : > { %v1850_v51 = vpop.f32.mrf.mxu1  ;;  %v1877_v15 = vadd.f32 %v1876_v63, %v1790_v20 }
 0x58f   : > { %v1851_v61 = vadd.f32 %v1850_v51, %v1788_v59  ;;  %v1892_v38 = vpop.f32.mrf.mxu0  ;;  %v1896_v17 = vmax.f32 %v1863_v27, 0.0 }
 0x590   : > { %v1893_v11 = vadd.f32 %v1892_v38, %v1791_v30  ;;  %v1897_v31 = vmax.f32 %v1877_v15, 0.0 }
 0x591   : > { %v1899_v7 = vmax.f32 %v1851_v61, 0.0 }
 0x592   : > { %v1902_v23 = vmax.f32 %v1893_v11, 0.0 }
 0x593   : > { %v1903_v47 = vpack.c.bf16 %v1899_v7, %v1895_v33 }
 0x594   : > { %v1906_v57 = vpack.c.bf16 %v1902_v23, %v1898_v14  ;;  %v1864_v13 = vpop.f32.mrf.mxu2 }
 0x595   : > { %v1865_v49 = vadd.f32 %v1864_v13, %v1789_v9  ;;  %v1878_v60 = vpop.f32.mrf.mxu3  ;;  %2171 = vmatmul.bf16.vlgmr.msra.gmra.mxu1 %v1903_v47  ;;  %v3303_v13 = vld [vmem:[%s809_s17] ss:$0 sm:$0xff]  ;;  %s3499_s17 = smov (!%p3146_p5), 64  }
 0x596   : > { %v1879_v16 = vadd.f32 %v1878_v60, %v1790_v20  ;;  %2213 = vmatmul.bf16.vlgmr.msrb.gmra.mxu0 %v1906_v57 }
 0x597   : > { %v1900_v8 = vmax.f32 %v1865_v49, 0.0 }
 0x598   : > { %v1901_v45 = vmax.f32 %v1879_v16, 0.0 }
 0x599   : > { %v1904_v22 = vpack.c.bf16 %v1900_v8, %v1896_v17  ;;  %v3304_v17 = vld [vmem:[%s812_s25] ss:$0 sm:$0xff] }
 0x59a   : > { %v1905_v28 = vpack.c.bf16 %v1901_v45, %v1897_v31 }
 0x59b   : > { %2185 = vmatmul.bf16.vlgmr.msra.gmra.mxu2 %v1904_v22 }
 0x59c   : > { %2199 = vmatmul.bf16.vlgmr.msrb.gmra.mxu3 %v1905_v28 }
 0x612   : > { %v2172_v10 = vpop.f32.mrf.mxu1 }
 0x613   : > { %v2214_v26 = vpop.f32.mrf.mxu0 }
 0x61a   : > { %v2174_v42 = vpop.f32.mrf.mxu1 }
 0x61b   : > { %v2216_v1 = vpop.f32.mrf.mxu0 }
 0x61e   : > { %v2186_v25 = vpop.f32.mrf.mxu2 }
 0x61f   : > { %v2187_v43 = vadd.f32 %v2186_v25, %v2172_v10  ;;  %v2200_v12 = vpop.f32.mrf.mxu3 }
 0x621   : > { %v2201_v24 = vadd.f32 %v2200_v12, %v2187_v43 }
 0x623   : > { %v2215_v19 = vadd.f32 %v2214_v26, %v2201_v24 }
 0x625   : > { %v2219_v35 = vadd.f32 %v2215_v19, %v4248_v39 }
 0x626   : > { %v2188_v48 = vpop.f32.mrf.mxu2 }
 0x627   : > { %v2189_v40 = vadd.f32 %v2188_v48, %v2174_v42  ;;  %v2202_v2 = vpop.f32.mrf.mxu3  ;;  %v2225_v56 = vadd.f32 %v3302_v54, %v2219_v35 }
 0x629   : > { %v2203_v18 = vadd.f32 %v2202_v2, %v2189_v40  ;;  %v2238_v37 = vmul.f32 %v2225_v56, %v2225_v56  ;;  %v2229_v36 = vsel %vm879_vm3, %v2225_v56, 0.0 }
 0x62b   : > { %v2217_v3 = vadd.f32 %v2216_v1, %v2203_v18  ;;  %v2240_v52 = vsel %vm879_vm3, %v2238_v37, 0.0 }
 0x62d   : > { %v2220_v50 = vadd.f32 %v2217_v3, %v4250_v34 }
 0x62f   : > { %v2226_v44 = vadd.f32 %v3302_v54, %v2220_v50 }
 0x631   : > { %v2230_v21 = vsel %vm879_vm3, %v2226_v44, 0.0  ;;  %v2239_v39 = vmul.f32 %v2226_v44, %v2226_v44 }
 0x632   : > { %v2231_v4 = vadd.f32 %v2230_v21, %v2229_v36 }
 0x633   : > { %v2241_v29 = vsel %vm879_vm3, %v2239_v39, 0.0 }
 0x634   : > { %v2232_v53 = vrot.slane %v2231_v4, 4  ;;  %v2242_v32 = vadd.f32 %v2241_v29, %v2240_v52 }
 0x636   : > { %v2233_v55 = vadd.f32 %v2232_v53, %v2231_v4  ;;  %v2243_v41 = vrot.slane %v2242_v32, 4 }
 0x638   : > { %v2234_v5 = vrot.slane %v2233_v55, 2  ;;  %v2244_v58 = vadd.f32 %v2243_v41, %v2242_v32 }
 0x63a   : > { %v2235_v59 = vadd.f32 %v2234_v5, %v2233_v55  ;;  %v2245_v34 = vrot.slane %v2244_v58, 2 }
 0x63c   : > { %v2236_v30 = vrot.slane %v2235_v59, 1  ;;  %v2246_v46 = vadd.f32 %v2245_v34, %v2244_v58 }
 0x63e   : > { %v2237_v62 = vadd.f32 %v2236_v30, %v2235_v59  ;;  %v2247_v63 = vrot.slane %v2246_v46, 1 }
 0x640   : > { %v2248_v6 = vadd.f32 %v2247_v63, %v2246_v46  ;;  %v2249_v51 = vmul.f32 0.0625, %v2237_v62 }
 0x642   : > { %v2250_v9 = vmul.f32 0.0625, %v2248_v6  ;;  %v2251_v61 = vmul.f32 %v2249_v51, %v2249_v51  ;;  %v2254_v15 = vsub.f32 %v2225_v56, %v2249_v51  ;;  %v2255_v57 = vsub.f32 %v2226_v44, %v2249_v51 }
 0x644   : > { %v2252_v38 = vsub.f32 %v2250_v9, %v2251_v61 }
 0x646   : > { %v2253_v20 = vmax.f32 %v2252_v38, 0.0 }
 0x648   : > { %v2256_v11 = vadd.f32 1e-05, %v2253_v20 }
 0x64a   : > { %3371 = vrsqrt.f32 %v2256_v11  ;;  %vm2263_vm8 = vweird.f32 %v2256_v11 }
 0x650   : > { %v3372_v33 = vpop.eup %3371 }
 0x651   : > { %v2258_v7 = vmul.f32 %v3372_v33, %v2256_v11  ;;  %vm2264_vm7 = vweird.f32 %v3372_v33 }
 0x652   : > { %vm2265_vm9 = vmor %vm2263_vm8, %vm2264_vm7 }
 0x653   : > { %v2259_v14 = vmul.f32 %v3372_v33, %v2258_v7 }
 0x655   : > { %v2260_v23 = vmul.f32 0.5, %v2259_v14 }
 0x657   : > { %v2261_v27 = vsub.f32 1.5, %v2260_v23 }
 0x659   : > { %v2262_v47 = vmul.f32 %v3372_v33, %v2261_v27 }
 0x65b   : > { %v2266_v49 = vsel %vm2265_vm9, %v3372_v33, %v2262_v47 }
 0x65c   : > { %v2267_v60 = vmul.f32 %v2266_v49, %v2254_v15  ;;  %v2268_v16 = vmul.f32 %v2266_v49, %v2255_v57 }
 0x65e   : > { %v2272_v8 = vmul.f32 %v3303_v13, %v2267_v60  ;;  %v2273_v31 = vmul.f32 %v3303_v13, %v2268_v16 }
 0x65f   : > { %2284 = sbr.rel (%p3146_p5) target bundleno = 2910 (0xb5e), region = 108 }
 0x660   : > { %v2277_v45 = vadd.f32 %v3304_v17, %v2272_v8  ;;  %v2278_v22 = vadd.f32 %v3304_v17, %v2273_v31 }
 0x662   : > { %2279 = vst.msk [vmem:[#allocation2] sm:$0xff] %vm879_vm3, %v2277_v45 }
 0x663   : > { %2280 = vst.msk [vmem:[#allocation2 + $0x8] sm:$0xff] %vm879_vm3, %v2278_v22 }
 0x664   : > { %v3260_v28 = vld [vmem:[%s4415_s16 + $0x18] sm:$0xff]  ;;  %2285 = vst.msk [vmem:[#allocation3] sm:$0xff] %vm879_vm3, %v2277_v45  ;;  %v3254_v10 = vld [vmem:[%s4412_s13 + $0x8] sm:$0xff]  ;;  %v2287_v25 = vsel %vm879_vm3, %v2277_v45, 0.0  ;;  %v2294_v12 = vsel %vm879_vm3, %v2278_v22, 0.0  ;;  %v3259_v26 = vld [vmem:[%s4415_s16 + $0x10] sm:$0xff]  ;;  %v2317_v2 = vpack.c.bf16 %v2278_v22, %v2277_v45 }
 0x665   : > { %2286 = vst.msk [vmem:[#allocation3 + $0x8] sm:$0xff] %vm879_vm3, %v2278_v22  ;;  %v2288_v43 = vrot.slane %v2287_v25, 4  ;;  %2400 = vmatpush.bf16.msra.mxu1 %v3260_v28  ;;  %2343 = vmatpush.bf16.msra.mxu0 %v3254_v10  ;;  %v3253_v24 = vld [vmem:[%s4412_s13] sm:$0xff]  ;;  %v3256_v19 = vld [vmem:[%s4413_s14 + $0x8] sm:$0xff]  ;;  %v2295_v42 = vrot.slane %v2294_v12, 4  ;;  %v3497_v35 = vmov 8.0  }
 0x666   : > { %3375 = vrcp.f32 %v3497_v35  ;;  %2437 = vmatpush.bf16.msra.mxu2 %v3256_v19  ;;  %v3255_v54 = vld [vmem:[%s4413_s14] sm:$0xff]  ;;  %v3258_v1 = vld [vmem:[%s4415_s16 + $0x8] sm:$0xff]  ;;  %vm2392_vm10 = vcmask 523264   ;;  %vm2315_vm12 = vcmask 254976   ;;  %vm2312_vm13 = vcmask 1041409  }
 0x667   : > { %v2289_v48 = vadd.f32 %v2288_v43, %v2287_v25  ;;  %v2296_v40 = vadd.f32 %v2295_v42, %v2294_v12  ;;  %v3257_v44 = vld [vmem:[%s4415_s16] sm:$0xff] }
 0x668   : > { %v2359_v52 = vld [vmem:[%s4469_s1] sm:$0x1] }
 0x669   : > { %v2290_v18 = vrot.slane %v2289_v48, 2  ;;  %2401 = vmatpush.bf16.msra.mxu1 %v3259_v26  ;;  %2344 = vmatpush.bf16.msra.mxu0 %v3253_v24  ;;  %v2297_v56 = vrot.slane %v2296_v40, 2 }
 0x66a   : > { %2438 = vmatpush.bf16.msra.mxu2 %v3255_v54 }
 0x66b   : > { %v2291_v3 = vadd.f32 %v2290_v18, %v2289_v48  ;;  %v2298_v50 = vadd.f32 %v2297_v56, %v2296_v40 }
 0x66c   : > { %v3376_v37 = vpop.eup %3375  ;;  %3155 = vmatmul.msk.bf16.vlgmr.msra.gmra.mxu0 %vm879_vm3, %v2317_v2 }
 0x66d   : > { %2402 = vmatpush.bf16.msra.mxu1 %v3258_v1  ;;  %v2302_v36 = vmul.f32 8.0, %v3376_v37  ;;  %v2292_v21 = vrot.slane %v2291_v3, 1  ;;  %v2299_v39 = vrot.slane %v2298_v50, 1  ;;  %vm2306_vm11 = vweird.f32 %v3376_v37 }
 0x66f   : > { %v2303_v4 = vsub.f32 1.0, %v2302_v36  ;;  %v2293_v53 = vadd.f32 %v2292_v21, %v2291_v3  ;;  %v2300_v32 = vadd.f32 %v2299_v39, %v2298_v50 }
 0x671   : > { %2403 = vmatpush.bf16.msra.mxu1 %v3257_v44  ;;  %v2304_v29 = vmul.f32 %v3376_v37, %v2303_v4 }
 0x673   : > { %v2305_v55 = vadd.f32 %v3376_v37, %v2304_v29 }
 0x674   : > { %3172 = vmatmul.msk.bf16.vlgmr.msra.gmra.mxu1 %vm2392_vm10, %v2359_v52 }
 0x675   : > { %v2307_v41 = vsel %vm2306_vm11, %v3376_v37, %v2305_v55 }
 0x676   : > { %v2308_v5 = vmul.f32 %v2307_v41, %v2293_v53  ;;  %v2309_v58 = vmul.f32 %v2307_v41, %v2300_v32 }
 0x678   : > { %v2313_v59 = vsel %vm2312_vm13, %v2309_v58, %v2308_v5  ;;  %v2353_v34 = vpack.c.bf16 %v2308_v5, %v2308_v5  ;;  %v2354_v30 = vpack.c.bf16 %v2309_v58, %v2309_v58 }
 0x679   : > { %2316 = vst.msk [vmem:[#allocation5] sm:$0x3] %vm2315_vm12, %v2313_v59 }
 0x67a   : > { %v2412_v46 = vunpack.c.l.b16 %v2353_v34  ;;  %v2413_v62 = vunpack.c.l.b16 %v2354_v30 }
 0x67c   : > { %v2414_v63 = vsel %vm2312_vm13, %v2413_v62, %v2412_v46 }
 0x67d   : > { %v2415_v6 = vpack.c.b16 %v2414_v63, %v2414_v63 }
 0x67f   : > { %3181 = vmatmul.msk.bf16.vlgmr.msra.gmra.mxu2 %vm879_vm3, %v2415_v6 }
 0x6e9   : > { %v2346_v51 = vpop.f32.mrf.mxu0 }
 0x6ea   : > { %v2351_v9 = vpack.c.bf16 %v2346_v51, %v2346_v51 }
 0x6ec   : > { %v2545_v61 = vunpack.c.l.b16 %v2351_v9  ;;  %v2458_v38 = vsel %vm879_vm3, %v2351_v9, 0 }
 0x6ed   : > { %2467 = vmatpush.bf16.xpose.msra.mxu3 %v2458_v38 }
 0x6ee   : > { %v2546_v20 = vpack.c.b16 %v2545_v61, %v2545_v61 }
 0x6f0   : > { %2547 = vrot.lane.b32.xlu2 %v2546_v20, %s3498_s23 }
 0x6f1   : > { %v2405_v11 = vpop.f32.mrf.mxu1  ;;  %v2348_v33 = vpop.f32.mrf.mxu0 }
 0x6f2   : > { %v2352_v7 = vpack.c.bf16 %v2348_v33, %v2348_v33  ;;  %v2409_v15 = vperm.slane %v2405_v11, 0 }
 0x6f4   : > { %v2569_v14 = vunpack.c.l.b16 %v2352_v7  ;;  %v2477_v23 = vsel %vm879_vm3, %v2352_v7, 0 }
 0x6f5   : > { %2486 = vmatpush.bf16.xpose.msrb.mxu0 %v2477_v23 }
 0x6f6   : > { %v2570_v27 = vpack.c.b16 %v2569_v14, %v2569_v14 }
 0x6f8   : > { %2571 = vrot.lane.b32.xlu2 %v2570_v27, %s3498_s23 }
 0x6f9   : > { %v2407_v47 = vpop.f32.mrf.mxu1 }
 0x702   : > { %v2440_v57 = vpop.f32.mrf.mxu2 }
 0x703   : > { %v2441_v13 = vadd.f32 %v2440_v57, %v2409_v15  ;;  %v3262_v15 = vld [vmem:[%s4470_s27 + $0x8] sm:$0xff]  ;;  %v3261_v57 = vld [vmem:[%s4470_s27] sm:$0xff] }
 0x704   : > { %2641 = vmatpush.bf16.msrb.mxu1 %v3262_v15 }
 0x705   : > { %v2445_v49 = vrot.slane %v2441_v13, 1  ;;  %v2446_v60 = vperm.slane %v2441_v13, 0 }
 0x707   : > { %v2447_v16 = vperm.slane %v2445_v49, 0  ;;  %v2450_v17 = vmul.f32 %v2446_v60, %v3634_v0 }
 0x708   : > { %2642 = vmatpush.bf16.msrb.mxu1 %v3261_v57 }
 0x709   : > { %v2451_v8 = vmul.f32 %v2447_v16, %v3634_v0  ;;  %v2452_v31 = vpack.c.bf16 %v2450_v17, %v2450_v17 }
 0x70a   : > { %v2442_v45 = vpop.f32.mrf.mxu2 }
 0x70b   : > { %3182 = vmatmul.msk.bf16.vlgmr.msra.gmra.mxu3 %vm879_vm3, %v2452_v31  ;;  %v2453_v22 = vpack.c.bf16 %v2451_v8, %v2451_v8 }
 0x70d   : > { %3183 = vmatmul.msk.bf16.vlgmr.msrb.gmra.mxu0 %vm879_vm3, %v2453_v22 }
 0x74a   : > { %v2548_v28 = vpop.permute.xlu2 %2547 }
 0x74b   : > { %v2553_v10 = vsel %vm1544_vm6, %v2548_v28, 0 }
 0x74c   : > { %2562 = vmatpush.bf16.msrb.mxu2 %v2553_v10 }
 0x752   : > { %v2572_v25 = vpop.permute.xlu2 %2571 }
 0x753   : > { %v2577_v43 = vsel %vm1544_vm6, %v2572_v25, 0 }
 0x754   : > { %2586 = vmatpush.bf16.msrb.mxu3 %v2577_v43 }
 0x78a   : > { %v2488_v12 = vpop.f32.mrf.mxu0 }
 0x78b   : > { %v2493_v48 = vmul.f32 0.5, %v2488_v12 }
 0x78d   : > { %v2497_v54 = vsel %vm1109_vm4, %v2493_v48, -inf }
 0x78e   : > { %v2469_v26 = vpop.f32.mrf.mxu3 }
 0x78f   : > { %v2492_v24 = vmul.f32 0.5, %v2469_v26 }
 0x791   : > { %v2494_v19 = vsel %vm1109_vm4, %v2492_v24, -inf }
 0x792   : > { %2495 = vmax.xlane.f32.xlu0 %v2494_v19  ;;  %v2490_v42 = vpop.f32.mrf.mxu0 }
 0x796   : > { %v2471_v35 = vpop.f32.mrf.mxu3 }
 0x79a   : > { %2498 = vmax.xlane.f32.xlu0 %v2497_v54 }
 0x7ae   : > { %2674 = vrot.lane.b32.xlu0 %v2570_v27, %s3499_s17 }
 0x805   : > { %v2496_v40 = vpop.xlane.xlu0 %2495 }
 0x806   : > { %v2500_v2 = vsub.f32 %v2492_v24, %v2496_v40 }
 0x808   : > { %v2502_v18 = vmul.f32 1.442695, %v2500_v2 }
 0x80a   : > { %3377 = vpow2.f32 %v2502_v18 }
 0x80d   : > { %v2499_v1 = vpop.xlane.xlu0 %2498 }
 0x80e   : > { %v2501_v56 = vsub.f32 %v2493_v48, %v2499_v1 }
 0x810   : > { %v3378_v3 = vpop.eup %3377  ;;  %v2504_v50 = vmul.f32 1.442695, %v2501_v56 }
 0x811   : > { %v2506_v37 = vsel %vm1109_vm4, %v3378_v3, 0.0 }
 0x812   : > { %3379 = vpow2.f32 %v2504_v50  ;;  %2507 = vadd.xlane.f32.xlu1 %v2506_v37 }
 0x818   : > { %v3380_v44 = vpop.eup %3379 }
 0x819   : > { %v2509_v36 = vsel %vm1109_vm4, %v3380_v44, 0.0 }
 0x81a   : > { %2510 = vadd.xlane.f32.xlu1 %v2509_v36 }
 0x820   : > { %v2675_v21 = vpop.permute.xlu0 %2674 }
 0x821   : > { %v2680_v39 = vsel %vm879_vm3, %v2675_v21, 0 }
 0x822   : > { %2689 = vmatpush.bf16.xpose.msra.mxu2 %v2680_v39 }
 0x833   : > { %2653 = vrot.lane.b32.xlu1 %v2546_v20, %s3499_s17 }
 0x885   : > { %v2508_v4 = vpop.xlane.xlu1 %2507 }
 0x886   : > { %3381 = vrcp.f32 %v2508_v4  ;;  %v2523_v55 = vand.u32 2147483648, %v2508_v4  ;;  %v2521_v5 = vand.u32 2147483647, %v2508_v4  ;;  %vm2517_vm14 = vweird.f32 %v2508_v4 }
 0x888   : > { %v2524_v34 = vor.u32 1.1754944e-38, %v2523_v55  ;;  %vm2522_vm0 = vcmp.eq.f32.partialorder %v2521_v5, 8.507059e+37 }
 0x88c   : > { %v3382_v52 = vpop.eup %3381 }
 0x88d   : > { %v2513_v29 = vmul.f32 %v3382_v52, %v2508_v4  ;;  %v2511_v53 = vpop.xlane.xlu1 %2510  ;;  %vm2518_vm6 = vweird.f32 %v3382_v52 }
 0x88e   : > { %3383 = vrcp.f32 %v2511_v53  ;;  %vm2519_vm15 = vmor %vm2517_vm14, %vm2518_vm6  ;;  %v2538_v51 = vand.u32 2147483648, %v2511_v53  ;;  %v2536_v38 = vand.u32 2147483647, %v2511_v53  ;;  %vm2532_vm2 = vweird.f32 %v2511_v53 }
 0x88f   : > { %v2514_v32 = vsub.f32 1.0, %v2513_v29 }
 0x890   : > { %v2539_v11 = vor.u32 1.1754944e-38, %v2538_v51  ;;  %vm2537_vm7 = vcmp.eq.f32.partialorder %v2536_v38, 8.507059e+37 }
 0x891   : > { %v2515_v41 = vmul.f32 %v3382_v52, %v2514_v32 }
 0x893   : > { %v2516_v58 = vadd.f32 %v3382_v52, %v2515_v41 }
 0x894   : > { %v3384_v59 = vpop.eup %3383 }
 0x895   : > { %v2528_v30 = vmul.f32 %v3384_v59, %v2511_v53  ;;  %v2520_v46 = vsel %vm2519_vm15, %v3382_v52, %v2516_v58  ;;  %vm2533_vm1 = vweird.f32 %v3384_v59 }
 0x896   : > { %v2525_v62 = vsel %vm2522_vm0, %v2524_v34, %v2520_v46  ;;  %vm2534_vm5 = vmor %vm2532_vm2, %vm2533_vm1 }
 0x897   : > { %v2529_v63 = vsub.f32 1.0, %v2528_v30  ;;  %v2526_v6 = vmul.f32 %v3378_v3, %v2525_v62 }
 0x899   : > { %v2530_v9 = vmul.f32 %v3384_v59, %v2529_v63  ;;  %v2542_v61 = vpack.c.bf16 %v2526_v6, %v2526_v6 }
 0x89b   : > { %3184 = vmatmul.msk.bf16.vlgmr.msrb.gmra.mxu2 %vm1109_vm4, %v2542_v61  ;;  %v2531_v20 = vadd.f32 %v3384_v59, %v2530_v9 }
 0x89d   : > { %v2535_v33 = vsel %vm2534_vm5, %v3384_v59, %v2531_v20 }
 0x89e   : > { %v2540_v7 = vsel %vm2537_vm7, %v2539_v11, %v2535_v33 }
 0x89f   : > { %v2541_v14 = vmul.f32 %v3380_v44, %v2540_v7 }
 0x8a1   : > { %v2543_v23 = vpack.c.bf16 %v2541_v14, %v2541_v14 }
 0x8a3   : > { %3185 = vmatmul.msk.bf16.vlgmr.msrb.gmra.mxu3 %vm1109_vm4, %v2543_v23  ;;  %vm2706_vm4 = vcmask 58368  }
 0x8a5   : > { %v2654_v27 = vpop.permute.xlu1 %2653 }
 0x8a6   : > { %v2659_v47 = vsel %vm879_vm3, %v2654_v27, 0 }
 0x8a7   : > { %2668 = vmatpush.bf16.xpose.msra.mxu0 %v2659_v47 }
 0x91e   : > { %v2564_v13 = vpop.f32.mrf.mxu2 }
 0x91f   : > { %v2592_v49 = vmul.f32 %v2564_v13, %v3634_v0 }
 0x921   : > { %v2594_v60 = vsel %vm879_vm3, %v2592_v49, 0.0 }
 0x922   : > { %v2595_v16 = vrot.slane %v2594_v60, 4 }
 0x924   : > { %v2596_v17 = vadd.f32 %v2595_v16, %v2594_v60 }
 0x926   : > { %v2597_v8 = vrot.slane %v2596_v17, 2  ;;  %v2566_v31 = vpop.f32.mrf.mxu2  ;;  %v2588_v45 = vpop.f32.mrf.mxu3 }
 0x927   : > { %v2593_v22 = vmul.f32 %v2588_v45, %v3634_v0 }
 0x928   : > { %v2598_v28 = vadd.f32 %v2597_v8, %v2596_v17 }
 0x929   : > { %v2601_v10 = vsel %vm879_vm3, %v2593_v22, 0.0 }
 0x92a   : > { %v2602_v25 = vrot.slane %v2601_v10, 4  ;;  %v2599_v43 = vrot.slane %v2598_v28, 1 }
 0x92c   : > { %v2603_v12 = vadd.f32 %v2602_v25, %v2601_v10  ;;  %v2600_v19 = vadd.f32 %v2599_v43, %v2598_v28 }
 0x92e   : > { %v2604_v26 = vrot.slane %v2603_v12, 2  ;;  %v2590_v24 = vpop.f32.mrf.mxu3  ;;  %v2608_v35 = vpack.c.bf16 %v2600_v19, %v2600_v19 }
 0x930   : > { %v2605_v42 = vadd.f32 %v2604_v26, %v2603_v12  ;;  %v2616_v2 = vunpack.c.l.b16 %v2608_v35 }
 0x932   : > { %v2606_v48 = vrot.slane %v2605_v42, 1 }
 0x934   : > { %v2607_v54 = vadd.f32 %v2606_v48, %v2605_v42 }
 0x936   : > { %v2609_v40 = vpack.c.bf16 %v2607_v54, %v2607_v54 }
 0x938   : > { %v2617_v18 = vunpack.c.l.b16 %v2609_v40 }
 0x93a   : > { %v2618_v1 = vsel %vm2312_vm13, %v2617_v18, %v2616_v2 }
 0x93b   : > { %v2619_v56 = vpack.c.b16 %v2618_v1, %v2618_v1 }
 0x93d   : > { %3194 = vmatmul.msk.bf16.vlgmr.msrb.gmra.mxu1 %vm879_vm3, %v2619_v56 }
 0x9ba   : > { %v2644_v0 = vpop.f32.mrf.mxu1 }
 0x9bb   : > { %v2649_v3 = vrot.slane %v2644_v0, 1  ;;  %v2651_v50 = vpack.c.bf16 %v2644_v0, %v2644_v0 }
 0x9bd   : > { %v2652_v37 = vpack.c.bf16 %v2649_v3, %v2649_v3  ;;  %3195 = vmatmul.msk.bf16.vlgmr.msra.gmra.mxu0 %vm879_vm3, %v2651_v50 }
 0x9bf   : > { %3196 = vmatmul.msk.bf16.vlgmr.msra.gmra.mxu2 %vm879_vm3, %v2652_v37 }
 0x9c2   : > { %v2646_v44 = vpop.f32.mrf.mxu1 }
 0xa3a   : > { %v2670_v36 = vpop.f32.mrf.mxu0 }
 0xa3b   : > { %v2695_v21 = vmul.f32 0.17677669, %v2670_v36 }
 0xa3d   : > { %3385 = vtanh.f32 %v2695_v21 }
 0xa42   : > { %v2672_v39 = vpop.f32.mrf.mxu0  ;;  %v2691_v4 = vpop.f32.mrf.mxu2 }
 0xa43   : > { %v2696_v52 = vmul.f32 0.17677669, %v2691_v4  ;;  %v3386_v29 = vpop.eup %3385 }
 0xa44   : > { %v2699_v41 = vmul.f32 10.0, %v3386_v29 }
 0xa45   : > { %3387 = vtanh.f32 %v2696_v52 }
 0xa4a   : > { %v2693_v53 = vpop.f32.mrf.mxu2 }
 0xa4b   : > { %v3388_v32 = vpop.eup %3387 }
 0xa4c   : > { %v2700_v55 = vmul.f32 10.0, %v3388_v32 }
 0xa4e   : > { %v2703_v5 = vrot.slane %v2700_v55, 7 }
 0xa50   : > { %v2704_v58 = vsel %vm2312_vm13, %v2703_v5, %v2699_v41 }
 0xa51   : > { %v2707_v59 = vsel %vm2706_vm4, %v2704_v58, -inf }
 0xa52   : > { %2708 = vmax.xlane.f32.xlu2 %v2707_v59 }
 0xac5   : > { %v2709_v34 = vpop.xlane.xlu2 %2708 }
 0xac6   : > { %v2711_v30 = vrot.slane %v2709_v34, 1  ;;  %v2714_v46 = vsub.f32 %v2699_v41, %v2709_v34 }
 0xac8   : > { %v2715_v62 = vsub.f32 %v2700_v55, %v2711_v30  ;;  %v2716_v63 = vmul.f32 1.442695, %v2714_v46 }
 0xaca   : > { %v2718_v6 = vmul.f32 1.442695, %v2715_v62 }
 0xacc   : > { %3389 = vpow2.f32 %v2718_v6 }
 0xacd   : > { %3391 = vpow2.f32 %v2716_v63 }
 0xad2   : > { %v3390_v51 = vpop.eup %3389 }
 0xad3   : > { %v2722_v9 = vrot.slane %v3390_v51, 7  ;;  %v3392_v61 = vpop.eup %3391 }
 0xad5   : > { %v2723_v38 = vsel %vm2312_vm13, %v2722_v9, %v3392_v61 }
 0xad6   : > { %v2725_v20 = vsel %vm2706_vm4, %v2723_v38, 0.0 }
 0xad7   : > { %2726 = vadd.xlane.f32.xlu0 %v2725_v20 }
 0xb4a   : > { %v2727_v11 = vpop.xlane.xlu0 %2726 }
 0xb4b   : > { %3393 = vlog2.f32 %v2727_v11 }
 0xb51   : > { %v3394_v33 = vpop.eup %3393 }
 0xb52   : > { %v2729_v7 = vmul.f32 0.6931472, %v3394_v33 }
 0xb54   : > { %v2730_v14 = vadd.f32 %v2729_v7, %v2709_v34 }
 0xb56   : > { %v2732_v23 = vrot.slane %v2730_v14, 1  ;;  %v2735_v47 = vsub.f32 %v2699_v41, %v2730_v14 }
 0xb58   : > { %v2736_v27 = vsub.f32 %v2700_v55, %v2732_v23 }
 0xb5a   : > { %v2739_v15 = vrot.slane %v2736_v27, 7 }
 0xb5c   : > { %v2740_v57 = vsel %vm2312_vm13, %v2739_v15, %v2735_v47 }
 0xb5d   : > { %2742 = vst.msk [vmem:[#allocation7] sm:$0x3] %vm2706_vm4, %v2740_v57 }
 0xb5e PF: > { %p3275_p6 = scmp.eq.s32.totalorder %s3626_s28, 1  ;;  %s3500_s22 = smov [#allocation5]  }
 0xb5f   : > { %s2763_s24 = sshll.u32 %s3500_s22, 4  ;;  %s4471_s2 = sld [smem:[#allocation23_spill]]  ;;  %s2764_s24 = int_to_ptr.vmem [resolvable:$true] %s2763_s24 }
 0xb60   : > { %s4472_s29 = sld [smem:[#allocation22_spill]]  ;;  %s3501_s5 = smov [#allocation3]  }
 0xb61   : > { %s2748_s21 = sshll.u32 %s3501_s5, 4  ;;  %s3502_s1 = smov 128   ;;  %s2749_s21 = int_to_ptr.vmem [resolvable:$true] %s2748_s21 }
 0xb62   : > { %s3503_s23 = smov 8   ;;  %s3504_s17 = smov [#allocation7]  }
 0xb63   : > { %s2775_s15 = sshll.u32 %s3504_s17, 4  ;;  %s4473_s18 = sld [smem:[#allocation24_spill]]  ;;  %s2776_s15 = int_to_ptr.vmem [resolvable:$true] %s2775_s15 }
 0xb65   : > { %s2765_s3 = sshll.u32 %s4471_s2, 4  ;;  %s2766_s3 = int_to_ptr.hbm [resolvable:$true] %s2765_s3 }
 0xb66   : > { %3266 = dma.vmem_to_hbm [thread:$0]  (%p3275_p6), %s2764_s24, 32, %s2766_s3, [#allocation6]  }
 0xb67   : > { %s2750_s4 = sshll.u32 %s4472_s29, 4  ;;  %s2751_s4 = int_to_ptr.hbm [resolvable:$true] %s2750_s4 }
 0xb68   : > { %3264 = dma.vmem_to_hbm [thread:$0]  (%p3275_p6), %s2749_s21, 256, %s2751_s4, [#allocation4], %s3502_s1, %s3502_s1, %s3503_s23  }
 0xb69   : > { %s2777_s22 = sshll.u32 %s4473_s18, 4  ;;  %s2778_s22 = int_to_ptr.hbm [resolvable:$true] %s2777_s22 }
 0xb6a   : > { %3268 = dma.vmem_to_hbm [thread:$0]  (%p3275_p6), %s2776_s15, 32, %s2778_s22, [#allocation6]  }
 0xb6b   : > { %3484 = dma.done.wait (%p3275_p6), [#allocation4], 256  }
 0xb6c   : > { %3486 = vsyncadd (%p3275_p6), [#allocation4], 4294967040 }
 0xb6d   : > { %3488 = dma.done.wait (%p3275_p6), [#allocation6], 64  }
 0xb6e   : > { %3490 = vsyncadd (%p3275_p6), [#allocation6], 4294967232 }
 0xb6f PF: > { %s4474_s24 = sld [smem:[#allocation10_spill]] }
 0xb75   : > { %s35_s3 = sadd.s32 1, %s4474_s24  }
 0xb76   : > { %p32_p7 = scmp.ge.s32.totalorder %s35_s3, 4  }
 0xb78   :  { %34 = sbr.rel (!%p32_p7) target bundleno = 17 (0x11), region = 178 }
 0xb7d   :  { %2801 = vsyncpa [#allocation4], 1 }
 0xb7e   :  { %2803 = vsyncpa [#allocation4 + $0x1], 1 }
 0xb7f   :  { %2804 = vsyncpa [#allocation6], 1 }

</bundles_post_ra>
